<compile_context>
chip_gen: v7x
topology: tpu7x:2x2x1
jax: 0.10.0
libtpu: 0.0.40
codegen_flags: <defaults>
</compile_context>

<pallas_src>
import functools

import jax
import jax.numpy as jnp
from jax.experimental import pallas as pl
from jax.experimental.pallas import tpu as pltpu

EPS = 1e-5        # PyTorch BatchNorm2d default eps
TM_MAX = 2048     # M-tile rows (multiple of 16 for bf16 sublane packing)


def _round_up(x, m):
    return (x + m - 1) // m * m


# ---------------------------------------------------------------------------
# Pass 1: tiled conv matmul + per-tile BatchNorm partial statistics.
# ---------------------------------------------------------------------------
def _conv_stats_kernel(p_ref, w_ref, conv_ref, sum_ref, sq_ref, *, tm, m_true):
    # p_ref: [TM, K] bf16; w_ref: [K, N] bf16 (constant block index -> fetched once).
    acc = jnp.dot(p_ref[...], w_ref[...], preferred_element_type=jnp.float32)  # [TM, N] f32
    conv_ref[...] = acc

    # Mask the zero-padded tail rows of the last tile out of the statistics.
    row = jax.lax.broadcasted_iota(jnp.int32, (tm, 1), 0) + pl.program_id(0) * tm
    masked = jnp.where(row < m_true, acc, 0.0)
    sum_ref[...] = jnp.sum(masked, axis=0, keepdims=True)[None]           # [1, 1, N]
    sq_ref[...] = jnp.sum(masked * masked, axis=0, keepdims=True)[None]   # [1, 1, N]


# ---------------------------------------------------------------------------
# Pass 2: fused (affine-folded) BatchNorm + ReLU, in place on the conv buffer.
# ---------------------------------------------------------------------------
def _bn_relu_kernel(conv_ref, scale_ref, shift_ref, o_ref):
    o_ref[...] = jnp.maximum(conv_ref[...] * scale_ref[...] + shift_ref[...], 0.0)


def _im2col(xp, kh, kw, sh, sw):
    """xp: reflect-padded NCHW input -> patches [B*oh*ow, C*kh*kw] ((c,kh,kw) order)."""
    B, C, Hp, Wp = xp.shape
    oh = (Hp - kh) // sh + 1
    ow = (Wp - kw) // sw + 1
    cols = []
    for i in range(kh):
        for j in range(kw):
            cols.append(xp[:, :, i:i + sh * (oh - 1) + 1:sh, j:j + sw * (ow - 1) + 1:sw])
    p = jnp.stack(cols, axis=2)                         # [B, C, kh*kw, oh, ow]
    p = p.reshape(B, C * kh * kw, oh, ow)               # matches torch weight flattening
    p = jnp.transpose(p, (0, 2, 3, 1)).reshape(B * oh * ow, C * kh * kw)
    return p, oh, ow


def cnn_block_forward(x, weight, gamma, beta, *, kernel=4, stride=(1, 1), padding=1,
                      use_bf16_matmul=True, channels_last=False):
    """x: [B, Cin, H, W] f32.  weight: [Cout, Cin, kh, kw] (torch layout).
    Returns NCHW (or [B, OH, OW, Cout] if channels_last=True)."""
    B = x.shape[0]
    cout = weight.shape[0]
    mm_dtype = jnp.bfloat16 if use_bf16_matmul else jnp.float32

    # Reflect pad + im2col (bf16 to halve the patch HBM bytes).
    xp = jnp.pad(x.astype(mm_dtype),
                 ((0, 0), (0, 0), (padding, padding), (padding, padding)),
                 mode="reflect")
    patches, oh, ow = _im2col(xp, kernel, kernel, stride[0], stride[1])
    M, K = patches.shape
    N = cout
    w2 = weight.reshape(cout, -1).T.astype(mm_dtype)     # [K, Cout]

    # M tiling: pad M up to a whole number of TM-row tiles (zero rows -> masked stats).
    tm = min(TM_MAX, _round_up(M, 16))
    grid_m = pl.cdiv(M, tm)
    mp = grid_m * tm
    if mp != M:
        patches = jnp.pad(patches, ((0, mp - M), (0, 0)))

    conv, psum, psq = pl.pallas_call(
        functools.partial(_conv_stats_kernel, tm=tm, m_true=M),
        grid=(grid_m,),
        in_specs=[
            pl.BlockSpec((tm, K), lambda i: (i, 0)),
            pl.BlockSpec((K, N), lambda i: (0, 0)),
        ],
        out_specs=[
            pl.BlockSpec((tm, N), lambda i: (i, 0)),
            pl.BlockSpec((1, 1, N), lambda i: (i, 0, 0)),
            pl.BlockSpec((1, 1, N), lambda i: (i, 0, 0)),
        ],
        out_shape=[
            jax.ShapeDtypeStruct((mp, N), jnp.float32),        # conv intermediate
            jax.ShapeDtypeStruct((grid_m, 1, N), jnp.float32),  # per-tile sum
            jax.ShapeDtypeStruct((grid_m, 1, N), jnp.float32),  # per-tile sum of squares
        ],
        compiler_params=pltpu.CompilerParams(dimension_semantics=("parallel",)),
    )(patches, w2)

    # Tiny f32 glue on [N]-sized vectors: reduce partials, fold BN into scale/shift.
    total = jnp.float32(M)
    mean = jnp.sum(psum, axis=(0, 1)) / total
    var = jnp.maximum(jnp.sum(psq, axis=(0, 1)) / total - mean * mean, 0.0)
    scale = gamma.astype(jnp.float32) * jax.lax.rsqrt(var + EPS)
    shift = beta.astype(jnp.float32) - mean * scale

    out = pl.pallas_call(
        _bn_relu_kernel,
        grid=(grid_m,),
        in_specs=[
            pl.BlockSpec((tm, N), lambda i: (i, 0)),
            pl.BlockSpec((1, N), lambda i: (0, 0)),
            pl.BlockSpec((1, N), lambda i: (0, 0)),
        ],
        out_specs=pl.BlockSpec((tm, N), lambda i: (i, 0)),
        out_shape=jax.ShapeDtypeStruct((mp, N), jnp.float32),
        input_output_aliases={0: 0},   # normalize in place on the conv buffer
        compiler_params=pltpu.CompilerParams(dimension_semantics=("parallel",)),
    )(conv, scale.reshape(1, N), shift.reshape(1, N))

    out = out[:M].reshape(B, oh, ow, N)     # channels-last [B, OH, OW, Cout]
    if channels_last:
        return out
    return out.transpose(0, 3, 1, 2)        # NCHW, matching the torch module


def _reference(x, weight, gamma, beta, *, match_bf16=False):
    if match_bf16:  # same bf16-operand / f32-accumulate policy as the kernel
        x = x.astype(jnp.bfloat16).astype(jnp.float32)
        weight = weight.astype(jnp.bfloat16).astype(jnp.float32)
    xp = jnp.pad(x, ((0, 0), (0, 0), (1, 1), (1, 1)), mode="reflect")
    conv = jax.lax.conv_general_dilated(
        xp, weight, window_strides=(1, 1), padding="VALID",
        dimension_numbers=("NCHW", "OIHW", "NCHW"))
    mean = conv.mean(axis=(0, 2, 3), keepdims=True)
    var = ((conv - mean) ** 2).mean(axis=(0, 2, 3), keepdims=True)
    y = (conv - mean) * jax.lax.rsqrt(var + EPS)
    y = y * gamma.reshape(1, -1, 1, 1) + beta.reshape(1, -1, 1, 1)
    return jnp.maximum(y, 0.0)


if __name__ == "__main__":
    key = jax.random.PRNGKey(0)
    k1, k2, k3, k4 = jax.random.split(key, 4)

    B, Cin, H, W = 2, 3, 16, 16
    Cout, KH = 32, 4

    x = jax.random.normal(k1, (B, Cin, H, W), dtype=jnp.float32)
    fan_in = Cin * KH * KH
    weight = jax.random.normal(k2, (Cout, Cin, KH, KH), dtype=jnp.float32) * (2.0 / fan_in) ** 0.5
    gamma = 1.0 + 0.1 * jax.random.normal(k3, (Cout,), dtype=jnp.float32)
    beta = 0.1 * jax.random.normal(k4, (Cout,), dtype=jnp.float32)

    fwd = jax.jit(cnn_block_forward)
    out = jax.block_until_ready(fwd(x, weight, gamma, beta))
    assert out.shape == (B, Cout, H - 1, W - 1), out.shape

    # Apples-to-apples check (reference uses the same bf16-operand policy).
    ref_bf16 = _reference(x, weight, gamma, beta, match_bf16=True)
    assert jnp.allclose(out, ref_bf16, atol=2e-3, rtol=2e-3), \
        float(jnp.max(jnp.abs(out - ref_bf16)))

    # Sanity vs pure-f32 module semantics (bf16 MXU operands cost ~1e-2 abs here).
    ref_f32 = _reference(x, weight, gamma, beta)
    assert jnp.allclose(out, ref_f32, atol=5e-2, rtol=5e-2), \
        float(jnp.max(jnp.abs(out - ref_f32)))

    print("KERNEL_OK")
</pallas_src>

<mosaic_0001>
module attributes {stable_mosaic.version = 11 : i64} {
  func.func @_conv_stats_kernel(%arg0: i32, %arg1: memref<464x48xbf16, #tpu.memory_space<vmem>>, %arg2: memref<48x32xbf16, #tpu.memory_space<vmem>>, %arg3: memref<464x32xf32, #tpu.memory_space<vmem>>, %arg4: memref<1x1x32xf32, #tpu.memory_space<vmem>>, %arg5: memref<1x1x32xf32, #tpu.memory_space<vmem>>) attributes {dimension_semantics = [#tpu.dimension_semantics<parallel>], iteration_bounds = array<i64: 1>, scalar_prefetch = 0 : i64, scratch_operands = 0 : i64, tpu.core_type = #tpu.core_type<tc>, window_params = [{transform_indices = @transform_0, window_bounds = array<i64: 464, 48>}, {pipeline_mode = #tpu.pipeline_mode<synchronous>, transform_indices = @transform_1, window_bounds = array<i64: 48, 32>}, {transform_indices = @transform_2, window_bounds = array<i64: 464, 32>}, {transform_indices = @transform_3, window_bounds = array<i64: 1, 1, 32>}, {transform_indices = @transform_4, window_bounds = array<i64: 1, 1, 32>}]} {
    %c0 = arith.constant 0 : index
    %c0_0 = arith.constant 0 : index
    %0 = vector.load %arg1[%c0, %c0_0] : memref<464x48xbf16, #tpu.memory_space<vmem>>, vector<464x48xbf16>
    %c0_1 = arith.constant 0 : index
    %c0_2 = arith.constant 0 : index
    %1 = vector.load %arg2[%c0_1, %c0_2] : memref<48x32xbf16, #tpu.memory_space<vmem>>, vector<48x32xbf16>
    %cst = arith.constant dense<0.000000e+00> : vector<464x32xf32>
    %2 = tpu.matmul %0, %1, %cst {dimension_numbers = #tpu.dot_dimension_numbers<[1], [0], [0], [1], [0, 0, 1, 1], [], []>} : vector<464x48xbf16>, vector<48x32xbf16>, vector<464x32xf32> -> vector<464x32xf32>
    %c0_3 = arith.constant 0 : index
    %c0_4 = arith.constant 0 : index
    %3 = vector.load %arg3[%c0_3, %c0_4] : memref<464x32xf32, #tpu.memory_space<vmem>>, vector<464x32xf32>
    tpu.vector_store %arg3[%c0_3, %c0_4], %2 {strides = array<i32>} : memref<464x32xf32, #tpu.memory_space<vmem>>, vector<464x32xf32>,
    %4 = tpu.iota {dimensions = array<i32: 0>} : vector<464x1xi32>
    %c464_i32 = arith.constant 464 : i32
    %5 = arith.muli %arg0, %c464_i32 : i32
    %6 = vector.broadcast %5 : i32 to vector<464x1xi32>
    %7 = arith.addi %4, %6 : vector<464x1xi32>
    %c450_i32 = arith.constant 450 : i32
    %8 = vector.broadcast %c450_i32 : i32 to vector<464x1xi32>
    %9 = arith.cmpi slt, %7, %8 : vector<464x1xi32>
    %cst_5 = arith.constant 0.000000e+00 : f32
    %10 = vector.shape_cast %9 : vector<464x1xi1> to vector<464x1xi1>
    %11 = vector.broadcast %10 : vector<464x1xi1> to vector<464x32xi1>
    %12 = vector.broadcast %cst_5 : f32 to vector<464x32xf32>
    %13 = arith.select %11, %2, %12 : vector<464x32xi1>, vector<464x32xf32>
    %cst_6 = arith.constant dense<0.000000e+00> : vector<32xf32>
    %14 = vector.multi_reduction <add>, %13, %cst_6 [0] : vector<464x32xf32> to vector<32xf32>
    %15 = vector.shape_cast %14 : vector<32xf32> to vector<1x32xf32>
    %16 = vector.shape_cast %15 : vector<1x32xf32> to vector<1x1x32xf32>
    %c0_7 = arith.constant 0 : index
    %c0_8 = arith.constant 0 : index
    %c0_9 = arith.constant 0 : index
    %17 = vector.load %arg4[%c0_7, %c0_8, %c0_9] : memref<1x1x32xf32, #tpu.memory_space<vmem>>, vector<1x1x32xf32>
    tpu.vector_store %arg4[%c0_7, %c0_8, %c0_9], %16 {strides = array<i32>} : memref<1x1x32xf32, #tpu.memory_space<vmem>>, vector<1x1x32xf32>,
    %18 = arith.mulf %13, %13 : vector<464x32xf32>
    %cst_10 = arith.constant dense<0.000000e+00> : vector<32xf32>
    %19 = vector.multi_reduction <add>, %18, %cst_10 [0] : vector<464x32xf32> to vector<32xf32>
    %20 = vector.shape_cast %19 : vector<32xf32> to vector<1x32xf32>
    %21 = vector.shape_cast %20 : vector<1x32xf32> to vector<1x1x32xf32>
    %c0_11 = arith.constant 0 : index
    %c0_12 = arith.constant 0 : index
    %c0_13 = arith.constant 0 : index
    %22 = vector.load %arg5[%c0_11, %c0_12, %c0_13] : memref<1x1x32xf32, #tpu.memory_space<vmem>>, vector<1x1x32xf32>
    tpu.vector_store %arg5[%c0_11, %c0_12, %c0_13], %21 {strides = array<i32>} : memref<1x1x32xf32, #tpu.memory_space<vmem>>, vector<1x1x32xf32>,
    return
  }
  func.func @transform_0(%arg0: i32) -> (i32, i32) {
    %c0_i32 = arith.constant 0 : i32
    %c0_i32_0 = arith.constant 0 : i32
    return %arg0, %c0_i32 : i32, i32
  }
  func.func @transform_1(%arg0: i32) -> (i32, i32) {
    %c0_i32 = arith.constant 0 : i32
    %c0_i32_0 = arith.constant 0 : i32
    %c0_i32_1 = arith.constant 0 : i32
    return %c0_i32, %c0_i32_0 : i32, i32
  }
  func.func @transform_2(%arg0: i32) -> (i32, i32) {
    %c0_i32 = arith.constant 0 : i32
    %c0_i32_0 = arith.constant 0 : i32
    return %arg0, %c0_i32 : i32, i32
  }
  func.func @transform_3(%arg0: i32) -> (i32, i32, i32) {
    %c0_i32 = arith.constant 0 : i32
    %c0_i32_0 = arith.constant 0 : i32
    %c0_i32_1 = arith.constant 0 : i32
    return %arg0, %c0_i32, %c0_i32_0 : i32, i32, i32
  }
  func.func @transform_4(%arg0: i32) -> (i32, i32, i32) {
    %c0_i32 = arith.constant 0 : i32
    %c0_i32_0 = arith.constant 0 : i32
    %c0_i32_1 = arith.constant 0 : i32
    return %arg0, %c0_i32, %c0_i32_0 : i32, i32, i32
  }
}

module attributes {stable_mosaic.version = 11 : i64} {
  func.func @_bn_relu_kernel(%arg0: i32, %arg1: memref<464x32xf32, #tpu.memory_space<vmem>>, %arg2: memref<1x32xf32, #tpu.memory_space<vmem>>, %arg3: memref<1x32xf32, #tpu.memory_space<vmem>>, %arg4: memref<464x32xf32, #tpu.memory_space<vmem>>) attributes {dimension_semantics = [#tpu.dimension_semantics<parallel>], iteration_bounds = array<i64: 1>, scalar_prefetch = 0 : i64, scratch_operands = 0 : i64, tpu.core_type = #tpu.core_type<tc>, window_params = [{transform_indices = @transform_0, window_bounds = array<i64: 464, 32>}, {pipeline_mode = #tpu.pipeline_mode<synchronous>, transform_indices = @transform_1, window_bounds = array<i64: 1, 32>}, {pipeline_mode = #tpu.pipeline_mode<synchronous>, transform_indices = @transform_2, window_bounds = array<i64: 1, 32>}, {transform_indices = @transform_3, window_bounds = array<i64: 464, 32>}]} {
    %c0 = arith.constant 0 : index
    %c0_0 = arith.constant 0 : index
    %0 = vector.load %arg1[%c0, %c0_0] : memref<464x32xf32, #tpu.memory_space<vmem>>, vector<464x32xf32>
    %c0_1 = arith.constant 0 : index
    %c0_2 = arith.constant 0 : index
    %1 = vector.load %arg2[%c0_1, %c0_2] : memref<1x32xf32, #tpu.memory_space<vmem>>, vector<1x32xf32>
    %2 = vector.broadcast %1 : vector<1x32xf32> to vector<464x32xf32>
    %3 = arith.mulf %0, %2 : vector<464x32xf32>
    %c0_3 = arith.constant 0 : index
    %c0_4 = arith.constant 0 : index
    %4 = vector.load %arg3[%c0_3, %c0_4] : memref<1x32xf32, #tpu.memory_space<vmem>>, vector<1x32xf32>
    %5 = vector.broadcast %4 : vector<1x32xf32> to vector<464x32xf32>
    %6 = arith.addf %3, %5 : vector<464x32xf32>
    %cst = arith.constant 0.000000e+00 : f32
    %7 = vector.broadcast %cst : f32 to vector<464x32xf32>
    %8 = arith.maximumf %6, %7 : vector<464x32xf32>
    %c0_5 = arith.constant 0 : index
    %c0_6 = arith.constant 0 : index
    %9 = vector.load %arg4[%c0_5, %c0_6] : memref<464x32xf32, #tpu.memory_space<vmem>>, vector<464x32xf32>
    tpu.vector_store %arg4[%c0_5, %c0_6], %8 {strides = array<i32>} : memref<464x32xf32, #tpu.memory_space<vmem>>, vector<464x32xf32>,
    return
  }
  func.func @transform_0(%arg0: i32) -> (i32, i32) {
    %c0_i32 = arith.constant 0 : i32
    %c0_i32_0 = arith.constant 0 : i32
    return %arg0, %c0_i32 : i32, i32
  }
  func.func @transform_1(%arg0: i32) -> (i32, i32) {
    %c0_i32 = arith.constant 0 : i32
    %c0_i32_0 = arith.constant 0 : i32
    %c0_i32_1 = arith.constant 0 : i32
    return %c0_i32, %c0_i32_0 : i32, i32
  }
  func.func @transform_2(%arg0: i32) -> (i32, i32) {
    %c0_i32 = arith.constant 0 : i32
    %c0_i32_0 = arith.constant 0 : i32
    %c0_i32_1 = arith.constant 0 : i32
    return %c0_i32, %c0_i32_0 : i32, i32
  }
  func.func @transform_3(%arg0: i32) -> (i32, i32) {
    %c0_i32 = arith.constant 0 : i32
    %c0_i32_0 = arith.constant 0 : i32
    return %arg0, %c0_i32 : i32, i32
  }
}

</mosaic_0001>

<bundles_post_ra>
// kernel: cnn_block_forward.3
= control target key start
LH: loop header
LB: loop body
LE: loop exit
PB: predicated region body
PF: predicated region fallthrough
CT: control target
= control target key end

     0   :  { %vm260_vm0 = vcmask 261120   ;;  %s877_s0 = inlined_call_operand.vmem [shape: f32[464,32], index: 0, kind: input, shape index: {}, may-alias: {0,3}]   ;;  %s878_s1 = inlined_call_operand.vmem [shape: f32[1,32], index: 1, kind: input, shape index: {}]   ;;  %s879_s2 = inlined_call_operand.vmem [shape: f32[1,32], index: 2, kind: input, shape index: {}]   ;;  %s880_s3 = inlined_call_operand.vmem [shape: f32[464,32], index: 3, kind: output, shape index: {}, may-alias: {0,3}]  }
   0x1   :  { %v14_v0 = vld [vmem:[%s877_s0] sm:$0xff]  ;;  %v15_v4 = vld [vmem:[%s877_s0 + $0x8] sm:$0xff]  ;;  %v16_v5 = vld [vmem:[%s877_s0 + $0x10] sm:$0xff] }
   0x2   :  { %v351_v1 = vld [vmem:[%s878_s1] ss:$0 sm:$0xff]  ;;  %v17_v6 = vld [vmem:[%s877_s0 + $0x18] sm:$0xff]  ;;  %v19_v11 = vld [vmem:[%s877_s0 + $0x28] sm:$0xff] }
   0x3   :  { %v356_v2 = vld [vmem:[%s879_s2] ss:$0 sm:$0xff]  ;;  %v79_v3 = vmul.f32 %v351_v1, %v14_v0  ;;  %v80_v7 = vmul.f32 %v351_v1, %v15_v4  ;;  %v81_v8 = vmul.f32 %v351_v1, %v16_v5  ;;  %v82_v9 = vmul.f32 %v351_v1, %v17_v6  ;;  %v20_v12 = vld [vmem:[%s877_s0 + $0x30] sm:$0xff]  ;;  %v21_v17 = vld [vmem:[%s877_s0 + $0x38] sm:$0xff] }
   0x4   :  { %v18_v10 = vld [vmem:[%s877_s0 + $0x20] sm:$0xff]  ;;  %v84_v15 = vmul.f32 %v351_v1, %v19_v11  ;;  %v85_v16 = vmul.f32 %v351_v1, %v20_v12  ;;  %v86_v21 = vmul.f32 %v351_v1, %v21_v17  ;;  %v23_v27 = vld [vmem:[%s877_s0 + $0x48] sm:$0xff]  ;;  %v24_v28 = vld [vmem:[%s877_s0 + $0x50] sm:$0xff] }
   0x5   :  { %v144_v13 = vadd.f32 %v356_v2, %v79_v3  ;;  %v83_v14 = vmul.f32 %v351_v1, %v18_v10  ;;  %v145_v18 = vadd.f32 %v356_v2, %v80_v7  ;;  %v146_v19 = vadd.f32 %v356_v2, %v81_v8  ;;  %v22_v22 = vld [vmem:[%s877_s0 + $0x40] sm:$0xff]  ;;  %v25_v29 = vld [vmem:[%s877_s0 + $0x58] sm:$0xff]  ;;  %v27_v35 = vld [vmem:[%s877_s0 + $0x68] sm:$0xff] }
   0x6   :  { %v147_v20 = vadd.f32 %v356_v2, %v82_v9  ;;  %v149_v25 = vadd.f32 %v356_v2, %v84_v15  ;;  %v150_v26 = vadd.f32 %v356_v2, %v85_v16  ;;  %v151_v33 = vadd.f32 %v356_v2, %v86_v21  ;;  %v26_v34 = vld [vmem:[%s877_s0 + $0x60] sm:$0xff]  ;;  %v28_v36 = vld [vmem:[%s877_s0 + $0x70] sm:$0xff] }
   0x7   :  { %v202_v23 = vmax.f32 %v144_v13, 0.0  ;;  %v148_v24 = vadd.f32 %v356_v2, %v83_v14  ;;  %v203_v30 = vmax.f32 %v145_v18, 0.0  ;;  %v204_v31 = vmax.f32 %v146_v19, 0.0 }
   0x8   :  { %v205_v32 = vmax.f32 %v147_v20, 0.0  ;;  %v207_v38 = vmax.f32 %v149_v25, 0.0  ;;  %v208_v39 = vmax.f32 %v150_v26, 0.0  ;;  %v87_v40 = vmul.f32 %v351_v1, %v22_v22 }
   0x9   :  { %261 = vst.msk [vmem:[%s880_s3] sm:$0xff] %vm260_vm0, %v202_v23  ;;  %v206_v37 = vmax.f32 %v148_v24, 0.0  ;;  %v209_v42 = vmax.f32 %v151_v33, 0.0  ;;  %v88_v43 = vmul.f32 %v351_v1, %v23_v27  ;;  %v89_v44 = vmul.f32 %v351_v1, %v24_v28 }
   0xa   :  { %v90_v45 = vmul.f32 %v351_v1, %v25_v29  ;;  %v152_v46 = vadd.f32 %v356_v2, %v87_v40  ;;  %v91_v47 = vmul.f32 %v351_v1, %v26_v34  ;;  %v92_v48 = vmul.f32 %v351_v1, %v27_v35 }
   0xb   :  { %v93_v49 = vmul.f32 %v351_v1, %v28_v36  ;;  %v153_v50 = vadd.f32 %v356_v2, %v88_v43  ;;  %v154_v51 = vadd.f32 %v356_v2, %v89_v44 }
   0xc   :  { %v155_v52 = vadd.f32 %v356_v2, %v90_v45  ;;  %v210_v55 = vmax.f32 %v152_v46, 0.0  ;;  %v156_v56 = vadd.f32 %v356_v2, %v91_v47  ;;  %v157_v57 = vadd.f32 %v356_v2, %v92_v48 }
   0xd   :  { %v158_v58 = vadd.f32 %v356_v2, %v93_v49  ;;  %v211_v62 = vmax.f32 %v153_v50, 0.0  ;;  %v212_v63 = vmax.f32 %v154_v51, 0.0 }
   0xe   :  { %v213_v0 = vmax.f32 %v155_v52, 0.0  ;;  %v214_v7 = vmax.f32 %v156_v56, 0.0  ;;  %v215_v8 = vmax.f32 %v157_v57, 0.0 }
   0xf   :  { %v216_v9 = vmax.f32 %v158_v58, 0.0 }
  0x10   :  { %v29_v41 = vld [vmem:[%s877_s0 + $0x78] sm:$0xff] }
  0x11   :  { %262 = vst.msk [vmem:[%s880_s3 + $0x8] sm:$0xff] %vm260_vm0, %v203_v30  ;;  %263 = vst.msk [vmem:[%s880_s3 + $0x10] sm:$0xff] %vm260_vm0, %v204_v31  ;;  %v94_v53 = vmul.f32 %v351_v1, %v29_v41 }
  0x12   :  { %264 = vst.msk [vmem:[%s880_s3 + $0x18] sm:$0xff] %vm260_vm0, %v205_v32  ;;  %265 = vst.msk [vmem:[%s880_s3 + $0x20] sm:$0xff] %vm260_vm0, %v206_v37 }
  0x13   :  { %266 = vst.msk [vmem:[%s880_s3 + $0x28] sm:$0xff] %vm260_vm0, %v207_v38  ;;  %267 = vst.msk [vmem:[%s880_s3 + $0x30] sm:$0xff] %vm260_vm0, %v208_v39  ;;  %v159_v3 = vadd.f32 %v356_v2, %v94_v53 }
  0x14   :  { %268 = vst.msk [vmem:[%s880_s3 + $0x38] sm:$0xff] %vm260_vm0, %v209_v42 }
  0x15   :  { %v217_v12 = vmax.f32 %v159_v3, 0.0 }
  0x1b   :  { %v30_v54 = vld [vmem:[%s877_s0 + $0x80] sm:$0xff]  ;;  %v31_v59 = vld [vmem:[%s877_s0 + $0x88] sm:$0xff]  ;;  %v32_v60 = vld [vmem:[%s877_s0 + $0x90] sm:$0xff] }
  0x1c   :  { %v33_v61 = vld [vmem:[%s877_s0 + $0x98] sm:$0xff]  ;;  %v34_v4 = vld [vmem:[%s877_s0 + $0xa0] sm:$0xff]  ;;  %v35_v5 = vld [vmem:[%s877_s0 + $0xa8] sm:$0xff]  ;;  %v95_v10 = vmul.f32 %v351_v1, %v30_v54  ;;  %v96_v13 = vmul.f32 %v351_v1, %v31_v59  ;;  %v97_v14 = vmul.f32 %v351_v1, %v32_v60 }
  0x1d   :  { %v36_v6 = vld [vmem:[%s877_s0 + $0xb0] sm:$0xff]  ;;  %v98_v15 = vmul.f32 %v351_v1, %v33_v61  ;;  %v99_v17 = vmul.f32 %v351_v1, %v34_v4  ;;  %v100_v18 = vmul.f32 %v351_v1, %v35_v5 }
  0x1e   :  { %269 = vst.msk [vmem:[%s880_s3 + $0x40] sm:$0xff] %vm260_vm0, %v210_v55  ;;  %v160_v16 = vadd.f32 %v356_v2, %v95_v10  ;;  %v101_v19 = vmul.f32 %v351_v1, %v36_v6  ;;  %v161_v20 = vadd.f32 %v356_v2, %v96_v13  ;;  %v162_v21 = vadd.f32 %v356_v2, %v97_v14 }
  0x1f   :  { %v163_v22 = vadd.f32 %v356_v2, %v98_v15  ;;  %v164_v26 = vadd.f32 %v356_v2, %v99_v17  ;;  %v165_v27 = vadd.f32 %v356_v2, %v100_v18 }
  0x20   :  { %v218_v25 = vmax.f32 %v160_v16, 0.0  ;;  %v166_v28 = vadd.f32 %v356_v2, %v101_v19  ;;  %v219_v32 = vmax.f32 %v161_v20, 0.0  ;;  %v220_v33 = vmax.f32 %v162_v21, 0.0 }
  0x21   :  { %v221_v34 = vmax.f32 %v163_v22, 0.0  ;;  %v222_v39 = vmax.f32 %v164_v26, 0.0  ;;  %v223_v40 = vmax.f32 %v165_v27, 0.0 }
  0x22   :  { %v224_v41 = vmax.f32 %v166_v28, 0.0 }
  0x25   :  { %v37_v11 = vld [vmem:[%s877_s0 + $0xb8] sm:$0xff] }
  0x26   :  { %270 = vst.msk [vmem:[%s880_s3 + $0x48] sm:$0xff] %vm260_vm0, %v211_v62  ;;  %271 = vst.msk [vmem:[%s880_s3 + $0x50] sm:$0xff] %vm260_vm0, %v212_v63  ;;  %v102_v23 = vmul.f32 %v351_v1, %v37_v11 }
  0x27   :  { %272 = vst.msk [vmem:[%s880_s3 + $0x58] sm:$0xff] %vm260_vm0, %v213_v0  ;;  %273 = vst.msk [vmem:[%s880_s3 + $0x60] sm:$0xff] %vm260_vm0, %v214_v7 }
  0x28   :  { %274 = vst.msk [vmem:[%s880_s3 + $0x68] sm:$0xff] %vm260_vm0, %v215_v8  ;;  %275 = vst.msk [vmem:[%s880_s3 + $0x70] sm:$0xff] %vm260_vm0, %v216_v9  ;;  %v167_v35 = vadd.f32 %v356_v2, %v102_v23 }
  0x29   :  { %276 = vst.msk [vmem:[%s880_s3 + $0x78] sm:$0xff] %vm260_vm0, %v217_v12 }
  0x2a   :  { %v225_v44 = vmax.f32 %v167_v35, 0.0 }
  0x30   :  { %v38_v24 = vld [vmem:[%s877_s0 + $0xc0] sm:$0xff]  ;;  %v39_v29 = vld [vmem:[%s877_s0 + $0xc8] sm:$0xff]  ;;  %v40_v30 = vld [vmem:[%s877_s0 + $0xd0] sm:$0xff] }
  0x31   :  { %v41_v31 = vld [vmem:[%s877_s0 + $0xd8] sm:$0xff]  ;;  %v42_v36 = vld [vmem:[%s877_s0 + $0xe0] sm:$0xff]  ;;  %v43_v37 = vld [vmem:[%s877_s0 + $0xe8] sm:$0xff]  ;;  %v103_v42 = vmul.f32 %v351_v1, %v38_v24  ;;  %v104_v45 = vmul.f32 %v351_v1, %v39_v29  ;;  %v105_v46 = vmul.f32 %v351_v1, %v40_v30 }
  0x32   :  { %v44_v38 = vld [vmem:[%s877_s0 + $0xf0] sm:$0xff]  ;;  %v106_v47 = vmul.f32 %v351_v1, %v41_v31  ;;  %v107_v49 = vmul.f32 %v351_v1, %v42_v36  ;;  %v108_v50 = vmul.f32 %v351_v1, %v43_v37 }
  0x33   :  { %277 = vst.msk [vmem:[%s880_s3 + $0x80] sm:$0xff] %vm260_vm0, %v218_v25  ;;  %v168_v48 = vadd.f32 %v356_v2, %v103_v42  ;;  %v109_v51 = vmul.f32 %v351_v1, %v44_v38  ;;  %v169_v52 = vadd.f32 %v356_v2, %v104_v45  ;;  %v170_v53 = vadd.f32 %v356_v2, %v105_v46 }
  0x34   :  { %v171_v54 = vadd.f32 %v356_v2, %v106_v47  ;;  %v172_v58 = vadd.f32 %v356_v2, %v107_v49  ;;  %v173_v59 = vadd.f32 %v356_v2, %v108_v50 }
  0x35   :  { %v226_v57 = vmax.f32 %v168_v48, 0.0  ;;  %v174_v60 = vadd.f32 %v356_v2, %v109_v51  ;;  %v227_v0 = vmax.f32 %v169_v52, 0.0  ;;  %v228_v3 = vmax.f32 %v170_v53, 0.0 }
  0x36   :  { %v229_v4 = vmax.f32 %v171_v54, 0.0  ;;  %v230_v9 = vmax.f32 %v172_v58, 0.0  ;;  %v231_v10 = vmax.f32 %v173_v59, 0.0 }
  0x37   :  { %v232_v11 = vmax.f32 %v174_v60, 0.0 }
  0x3a   :  { %v45_v43 = vld [vmem:[%s877_s0 + $0xf8] sm:$0xff] }
  0x3b   :  { %278 = vst.msk [vmem:[%s880_s3 + $0x88] sm:$0xff] %vm260_vm0, %v219_v32  ;;  %279 = vst.msk [vmem:[%s880_s3 + $0x90] sm:$0xff] %vm260_vm0, %v220_v33  ;;  %v110_v55 = vmul.f32 %v351_v1, %v45_v43 }
  0x3c   :  { %280 = vst.msk [vmem:[%s880_s3 + $0x98] sm:$0xff] %vm260_vm0, %v221_v34  ;;  %281 = vst.msk [vmem:[%s880_s3 + $0xa0] sm:$0xff] %vm260_vm0, %v222_v39 }
  0x3d   :  { %282 = vst.msk [vmem:[%s880_s3 + $0xa8] sm:$0xff] %vm260_vm0, %v223_v40  ;;  %283 = vst.msk [vmem:[%s880_s3 + $0xb0] sm:$0xff] %vm260_vm0, %v224_v41  ;;  %v175_v5 = vadd.f32 %v356_v2, %v110_v55 }
  0x3e   :  { %284 = vst.msk [vmem:[%s880_s3 + $0xb8] sm:$0xff] %vm260_vm0, %v225_v44 }
  0x3f   :  { %v233_v14 = vmax.f32 %v175_v5, 0.0 }
  0x45   :  { %v46_v56 = vld [vmem:[%s877_s0 + $0x100] sm:$0xff]  ;;  %v47_v61 = vld [vmem:[%s877_s0 + $0x108] sm:$0xff]  ;;  %v48_v62 = vld [vmem:[%s877_s0 + $0x110] sm:$0xff] }
  0x46   :  { %v49_v63 = vld [vmem:[%s877_s0 + $0x118] sm:$0xff]  ;;  %v50_v6 = vld [vmem:[%s877_s0 + $0x120] sm:$0xff]  ;;  %v51_v7 = vld [vmem:[%s877_s0 + $0x128] sm:$0xff]  ;;  %v111_v12 = vmul.f32 %v351_v1, %v46_v56  ;;  %v112_v15 = vmul.f32 %v351_v1, %v47_v61  ;;  %v113_v16 = vmul.f32 %v351_v1, %v48_v62 }
  0x47   :  { %v52_v8 = vld [vmem:[%s877_s0 + $0x130] sm:$0xff]  ;;  %v114_v17 = vmul.f32 %v351_v1, %v49_v63  ;;  %v115_v19 = vmul.f32 %v351_v1, %v50_v6  ;;  %v116_v20 = vmul.f32 %v351_v1, %v51_v7 }
  0x48   :  { %285 = vst.msk [vmem:[%s880_s3 + $0xc0] sm:$0xff] %vm260_vm0, %v226_v57  ;;  %v176_v18 = vadd.f32 %v356_v2, %v111_v12  ;;  %v117_v21 = vmul.f32 %v351_v1, %v52_v8  ;;  %v177_v22 = vadd.f32 %v356_v2, %v112_v15  ;;  %v178_v23 = vadd.f32 %v356_v2, %v113_v16 }
  0x49   :  { %v179_v24 = vadd.f32 %v356_v2, %v114_v17  ;;  %v180_v28 = vadd.f32 %v356_v2, %v115_v19  ;;  %v181_v29 = vadd.f32 %v356_v2, %v116_v20 }
  0x4a   :  { %v234_v27 = vmax.f32 %v176_v18, 0.0  ;;  %v182_v30 = vadd.f32 %v356_v2, %v117_v21  ;;  %v235_v34 = vmax.f32 %v177_v22, 0.0  ;;  %v236_v35 = vmax.f32 %v178_v23, 0.0 }
  0x4b   :  { %v237_v36 = vmax.f32 %v179_v24, 0.0  ;;  %v238_v41 = vmax.f32 %v180_v28, 0.0  ;;  %v239_v42 = vmax.f32 %v181_v29, 0.0 }
  0x4c   :  { %v240_v43 = vmax.f32 %v182_v30, 0.0 }
  0x4f   :  { %v53_v13 = vld [vmem:[%s877_s0 + $0x138] sm:$0xff] }
  0x50   :  { %286 = vst.msk [vmem:[%s880_s3 + $0xc8] sm:$0xff] %vm260_vm0, %v227_v0  ;;  %287 = vst.msk [vmem:[%s880_s3 + $0xd0] sm:$0xff] %vm260_vm0, %v228_v3  ;;  %v118_v25 = vmul.f32 %v351_v1, %v53_v13 }
  0x51   :  { %288 = vst.msk [vmem:[%s880_s3 + $0xd8] sm:$0xff] %vm260_vm0, %v229_v4  ;;  %289 = vst.msk [vmem:[%s880_s3 + $0xe0] sm:$0xff] %vm260_vm0, %v230_v9 }
  0x52   :  { %290 = vst.msk [vmem:[%s880_s3 + $0xe8] sm:$0xff] %vm260_vm0, %v231_v10  ;;  %291 = vst.msk [vmem:[%s880_s3 + $0xf0] sm:$0xff] %vm260_vm0, %v232_v11  ;;  %v183_v37 = vadd.f32 %v356_v2, %v118_v25 }
  0x53   :  { %292 = vst.msk [vmem:[%s880_s3 + $0xf8] sm:$0xff] %vm260_vm0, %v233_v14 }
  0x54   :  { %v241_v46 = vmax.f32 %v183_v37, 0.0 }
  0x5a   :  { %v54_v26 = vld [vmem:[%s877_s0 + $0x140] sm:$0xff]  ;;  %v55_v31 = vld [vmem:[%s877_s0 + $0x148] sm:$0xff]  ;;  %v56_v32 = vld [vmem:[%s877_s0 + $0x150] sm:$0xff] }
  0x5b   :  { %v57_v33 = vld [vmem:[%s877_s0 + $0x158] sm:$0xff]  ;;  %v58_v38 = vld [vmem:[%s877_s0 + $0x160] sm:$0xff]  ;;  %v59_v39 = vld [vmem:[%s877_s0 + $0x168] sm:$0xff]  ;;  %v119_v44 = vmul.f32 %v351_v1, %v54_v26  ;;  %v120_v47 = vmul.f32 %v351_v1, %v55_v31  ;;  %v121_v48 = vmul.f32 %v351_v1, %v56_v32 }
  0x5c   :  { %v60_v40 = vld [vmem:[%s877_s0 + $0x170] sm:$0xff]  ;;  %v122_v49 = vmul.f32 %v351_v1, %v57_v33  ;;  %v123_v51 = vmul.f32 %v351_v1, %v58_v38  ;;  %v124_v52 = vmul.f32 %v351_v1, %v59_v39 }
  0x5d   :  { %293 = vst.msk [vmem:[%s880_s3 + $0x100] sm:$0xff] %vm260_vm0, %v234_v27  ;;  %v184_v50 = vadd.f32 %v356_v2, %v119_v44  ;;  %v125_v53 = vmul.f32 %v351_v1, %v60_v40  ;;  %v185_v54 = vadd.f32 %v356_v2, %v120_v47  ;;  %v186_v55 = vadd.f32 %v356_v2, %v121_v48 }
  0x5e   :  { %v187_v56 = vadd.f32 %v356_v2, %v122_v49  ;;  %v188_v60 = vadd.f32 %v356_v2, %v123_v51  ;;  %v189_v61 = vadd.f32 %v356_v2, %v124_v52 }
  0x5f   :  { %v242_v59 = vmax.f32 %v184_v50, 0.0  ;;  %v190_v62 = vadd.f32 %v356_v2, %v125_v53  ;;  %v243_v4 = vmax.f32 %v185_v54, 0.0  ;;  %v244_v5 = vmax.f32 %v186_v55, 0.0 }
  0x60   :  { %v245_v6 = vmax.f32 %v187_v56, 0.0  ;;  %v246_v11 = vmax.f32 %v188_v60, 0.0  ;;  %v247_v12 = vmax.f32 %v189_v61, 0.0 }
  0x61   :  { %v248_v13 = vmax.f32 %v190_v62, 0.0 }
  0x64   :  { %v61_v45 = vld [vmem:[%s877_s0 + $0x178] sm:$0xff] }
  0x65   :  { %294 = vst.msk [vmem:[%s880_s3 + $0x108] sm:$0xff] %vm260_vm0, %v235_v34  ;;  %295 = vst.msk [vmem:[%s880_s3 + $0x110] sm:$0xff] %vm260_vm0, %v236_v35  ;;  %v126_v57 = vmul.f32 %v351_v1, %v61_v45 }
  0x66   :  { %296 = vst.msk [vmem:[%s880_s3 + $0x118] sm:$0xff] %vm260_vm0, %v237_v36  ;;  %297 = vst.msk [vmem:[%s880_s3 + $0x120] sm:$0xff] %vm260_vm0, %v238_v41 }
  0x67   :  { %298 = vst.msk [vmem:[%s880_s3 + $0x128] sm:$0xff] %vm260_vm0, %v239_v42  ;;  %299 = vst.msk [vmem:[%s880_s3 + $0x130] sm:$0xff] %vm260_vm0, %v240_v43  ;;  %v191_v7 = vadd.f32 %v356_v2, %v126_v57 }
  0x68   :  { %300 = vst.msk [vmem:[%s880_s3 + $0x138] sm:$0xff] %vm260_vm0, %v241_v46 }
  0x69   :  { %v249_v16 = vmax.f32 %v191_v7, 0.0 }
  0x6f   :  { %v62_v58 = vld [vmem:[%s877_s0 + $0x180] sm:$0xff]  ;;  %v63_v63 = vld [vmem:[%s877_s0 + $0x188] sm:$0xff]  ;;  %v64_v0 = vld [vmem:[%s877_s0 + $0x190] sm:$0xff] }
  0x70   :  { %v65_v3 = vld [vmem:[%s877_s0 + $0x198] sm:$0xff]  ;;  %v66_v8 = vld [vmem:[%s877_s0 + $0x1a0] sm:$0xff]  ;;  %v67_v9 = vld [vmem:[%s877_s0 + $0x1a8] sm:$0xff]  ;;  %v127_v14 = vmul.f32 %v351_v1, %v62_v58  ;;  %v128_v17 = vmul.f32 %v351_v1, %v63_v63  ;;  %v129_v18 = vmul.f32 %v351_v1, %v64_v0 }
  0x71   :  { %v68_v10 = vld [vmem:[%s877_s0 + $0x1b0] sm:$0xff]  ;;  %v130_v19 = vmul.f32 %v351_v1, %v65_v3  ;;  %v131_v21 = vmul.f32 %v351_v1, %v66_v8  ;;  %v132_v22 = vmul.f32 %v351_v1, %v67_v9 }
  0x72   :  { %301 = vst.msk [vmem:[%s880_s3 + $0x140] sm:$0xff] %vm260_vm0, %v242_v59  ;;  %v192_v20 = vadd.f32 %v356_v2, %v127_v14  ;;  %v133_v23 = vmul.f32 %v351_v1, %v68_v10  ;;  %v193_v24 = vadd.f32 %v356_v2, %v128_v17  ;;  %v194_v25 = vadd.f32 %v356_v2, %v129_v18 }
  0x73   :  { %v195_v26 = vadd.f32 %v356_v2, %v130_v19  ;;  %v196_v30 = vadd.f32 %v356_v2, %v131_v21  ;;  %v197_v31 = vadd.f32 %v356_v2, %v132_v22 }
  0x74   :  { %v250_v29 = vmax.f32 %v192_v20, 0.0  ;;  %v198_v32 = vadd.f32 %v356_v2, %v133_v23  ;;  %v251_v34 = vmax.f32 %v193_v24, 0.0  ;;  %v252_v35 = vmax.f32 %v194_v25, 0.0 }
  0x75   :  { %v253_v36 = vmax.f32 %v195_v26, 0.0  ;;  %v254_v38 = vmax.f32 %v196_v30, 0.0  ;;  %v255_v39 = vmax.f32 %v197_v31, 0.0 }
  0x76   :  { %v256_v40 = vmax.f32 %v198_v32, 0.0 }
  0x79   :  { %v69_v15 = vld [vmem:[%s877_s0 + $0x1b8] sm:$0xff] }
  0x7a   :  { %302 = vst.msk [vmem:[%s880_s3 + $0x148] sm:$0xff] %vm260_vm0, %v243_v4  ;;  %303 = vst.msk [vmem:[%s880_s3 + $0x150] sm:$0xff] %vm260_vm0, %v244_v5  ;;  %v134_v27 = vmul.f32 %v351_v1, %v69_v15 }
  0x7b   :  { %304 = vst.msk [vmem:[%s880_s3 + $0x158] sm:$0xff] %vm260_vm0, %v245_v6  ;;  %305 = vst.msk [vmem:[%s880_s3 + $0x160] sm:$0xff] %vm260_vm0, %v246_v11 }
  0x7c   :  { %306 = vst.msk [vmem:[%s880_s3 + $0x168] sm:$0xff] %vm260_vm0, %v247_v12  ;;  %307 = vst.msk [vmem:[%s880_s3 + $0x170] sm:$0xff] %vm260_vm0, %v248_v13  ;;  %v199_v37 = vadd.f32 %v356_v2, %v134_v27 }
  0x7d   :  { %308 = vst.msk [vmem:[%s880_s3 + $0x178] sm:$0xff] %vm260_vm0, %v249_v16 }
  0x7e   :  { %v257_v42 = vmax.f32 %v199_v37, 0.0 }
  0x84   :  { %v70_v28 = vld [vmem:[%s877_s0 + $0x1c0] sm:$0xff]  ;;  %v71_v33 = vld [vmem:[%s877_s0 + $0x1c8] sm:$0xff] }
  0x85   :  { %309 = vst.msk [vmem:[%s880_s3 + $0x180] sm:$0xff] %vm260_vm0, %v250_v29  ;;  %v135_v41 = vmul.f32 %v351_v1, %v70_v28  ;;  %310 = vst.msk [vmem:[%s880_s3 + $0x188] sm:$0xff] %vm260_vm0, %v251_v34  ;;  %v136_v43 = vmul.f32 %v351_v1, %v71_v33 }
  0x86   :  { %311 = vst.msk [vmem:[%s880_s3 + $0x190] sm:$0xff] %vm260_vm0, %v252_v35  ;;  %312 = vst.msk [vmem:[%s880_s3 + $0x198] sm:$0xff] %vm260_vm0, %v253_v36 }
  0x87   :  { %313 = vst.msk [vmem:[%s880_s3 + $0x1a0] sm:$0xff] %vm260_vm0, %v254_v38  ;;  %314 = vst.msk [vmem:[%s880_s3 + $0x1a8] sm:$0xff] %vm260_vm0, %v255_v39  ;;  %v200_v44 = vadd.f32 %v356_v2, %v135_v41  ;;  %v201_v1 = vadd.f32 %v356_v2, %v136_v43 }
  0x88   :  { %315 = vst.msk [vmem:[%s880_s3 + $0x1b0] sm:$0xff] %vm260_vm0, %v256_v40  ;;  %316 = vst.msk [vmem:[%s880_s3 + $0x1b8] sm:$0xff] %vm260_vm0, %v257_v42 }
  0x89   :  { %v258_v45 = vmax.f32 %v200_v44, 0.0  ;;  %v259_v46 = vmax.f32 %v201_v1, 0.0 }
  0x8b   :  { %317 = vst.msk [vmem:[%s880_s3 + $0x1c0] sm:$0xff] %vm260_vm0, %v258_v45  ;;  %318 = vst.msk [vmem:[%s880_s3 + $0x1c8] sm:$0xff] %vm260_vm0, %v259_v46 }

// kernel: cnn_block_forward.2
= control target key start
LH: loop header
LB: loop body
LE: loop exit
PB: predicated region body
PF: predicated region fallthrough
CT: control target
= control target key end

     0   :  { %v1575_v0 = vmov 0.0   ;;  %vm1576_vm0 = vmmov 0   ;;  %vm242_vm1 = vcmask 392192   ;;  %vm595_vm2 = vcmask 261120   ;;  %s2303_s1 = inlined_call_operand.vmem [shape: bf16[48,32], index: 1, kind: input, shape index: {}]   ;;  %s2304_s0 = inlined_call_operand.vmem [shape: bf16[464,48], index: 0, kind: input, shape index: {}]   ;;  %s2305_s2 = inlined_call_operand.vmem [shape: f32[464,32], index: 2, kind: output, shape index: {0}]   ;;  %s2306_s3 = inlined_call_operand.vmem [shape: f32[1,1,32], index: 3, kind: output, shape index: {1}]   ;;  %s2307_s4 = inlined_call_operand.vmem [shape: f32[1,1,32], index: 4, kind: output, shape index: {2}]  }
   0x1   :  { %1413 = vmatprep.subr.bf16.mxu0 %v1575_v0  ;;  %v1543_v1 = vld [vmem:[%s2303_s1] sm:$0xff]   ;;  %1419 = vmatprep.mubr.msk.bf16.mxu0 %vm1576_vm0, %v1575_v0  ;;  %v1544_v2 = vld [vmem:[%s2303_s1 + $0x8] sm:$0xff]   ;;  %v1545_v3 = vld [vmem:[%s2303_s1 + $0x10] sm:$0xff]   ;;  %vm1126_vm4 = vcmask 253952  }
   0x2   :  { %1535 = vmatprep.subr.bf16.mxu1 %v1575_v0  ;;  %1479 = vmatprep.mubr.msk.bf16.mxu1 %vm1576_vm0, %v1575_v0  ;;  %v1546_v4 = vld [vmem:[%s2304_s0] sm:$0xff]   ;;  %v1554_v5 = vld [vmem:[%s2304_s0 + $0x78] sm:$0xff]   ;;  %v1547_v6 = vld [vmem:[%s2304_s0 + $0x8] sm:$0xff]  }
   0x3   :  { %1414 = vmatpush3.bf16.msra.mxu0 %v1543_v1  ;;  %1538 = vmatpush3.bf16.msra.mxu1 %v1543_v1  ;;  %v1556_v7 = vld [vmem:[%s2304_s0 + $0x80] sm:$0xff]   ;;  %v1548_v8 = vld [vmem:[%s2304_s0 + $0x10] sm:$0xff]   ;;  %v1558_v9 = vld [vmem:[%s2304_s0 + $0x88] sm:$0xff]  }
   0x4   :  { %1415 = vmatprep.subr.bf16.mxu0 %v1575_v0  ;;  %1536 = vmatprep.subr.bf16.mxu1 %v1575_v0  ;;  %v1549_v10 = vld [vmem:[%s2304_s0 + $0x18] sm:$0xff]   ;;  %v1560_v11 = vld [vmem:[%s2304_s0 + $0x90] sm:$0xff]   ;;  %v1550_v12 = vld [vmem:[%s2304_s0 + $0x20] sm:$0xff]  }
   0x5   :  { %v1562_v13 = vld [vmem:[%s2304_s0 + $0x98] sm:$0xff]   ;;  %v1551_v14 = vld [vmem:[%s2304_s0 + $0x28] sm:$0xff]   ;;  %v1564_v15 = vld [vmem:[%s2304_s0 + $0xa0] sm:$0xff]  }
   0x6   :  { %v1552_v16 = vld [vmem:[%s2304_s0 + $0x30] sm:$0xff]   ;;  %v1566_v17 = vld [vmem:[%s2304_s0 + $0xa8] sm:$0xff]   ;;  %v1553_v18 = vld [vmem:[%s2304_s0 + $0x38] sm:$0xff]  }
   0x7   :  { %1416 = vmatpush3.bf16.msra.mxu0 %v1544_v2  ;;  %1539 = vmatpush3.bf16.msra.mxu1 %v1544_v2  ;;  %v1568_v19 = vld [vmem:[%s2304_s0 + $0xb0] sm:$0xff]   ;;  %v1555_v20 = vld [vmem:[%s2304_s0 + $0x40] sm:$0xff]   ;;  %v1569_v21 = vld [vmem:[%s2304_s0 + $0xb8] sm:$0xff]  }
   0x8   :  { %1417 = vmatprep.subr.bf16.mxu0 %v1575_v0  ;;  %1537 = vmatprep.subr.bf16.mxu1 %v1575_v0  ;;  %v1557_v22 = vld [vmem:[%s2304_s0 + $0x48] sm:$0xff]   ;;  %v1570_v23 = vld [vmem:[%s2304_s0 + $0xc0] sm:$0xff]   ;;  %v1559_v24 = vld [vmem:[%s2304_s0 + $0x50] sm:$0xff]  }
   0x9   :  { %v1571_v25 = vld [vmem:[%s2304_s0 + $0xc8] sm:$0xff]   ;;  %v1561_v26 = vld [vmem:[%s2304_s0 + $0x58] sm:$0xff]   ;;  %v1572_v27 = vld [vmem:[%s2304_s0 + $0xd0] sm:$0xff]  }
   0xa   :  { %v1563_v28 = vld [vmem:[%s2304_s0 + $0x60] sm:$0xff]   ;;  %v1573_v29 = vld [vmem:[%s2304_s0 + $0xd8] sm:$0xff]   ;;  %v1565_v30 = vld [vmem:[%s2304_s0 + $0x68] sm:$0xff]  }
   0xb   :  { %1418 = vmatpush3.bf16.msra.mxu0 %v1545_v3  ;;  %1540 = vmatpush3.bf16.msra.mxu1 %v1545_v3  ;;  %v1574_v31 = vld [vmem:[%s2304_s0 + $0xe0] sm:$0xff]   ;;  %v1567_v32 = vld [vmem:[%s2304_s0 + $0x70] sm:$0xff]  }
   0xe   :  { %1420 = vmatmul.mubr.msk.bf16.vlgmr.msra.gmra.mrb[0].mxu0 %vm242_vm1, %v1546_v4  ;;  %1480 = vmatmul.mubr.msk.bf16.vlgmr.msra.gmra.mrb[0].mxu1 %vm242_vm1, %v1554_v5 }
   0xf   :  { %1423 = vmatprep.mubr.msk.bf16.mxu0 %vm1576_vm0, %v1575_v0  ;;  %1483 = vmatprep.mubr.msk.bf16.mxu1 %vm1576_vm0, %v1575_v0 }
  0x16   :  { %1424 = vmatmul.mubr.msk.bf16.gmra.mrb[4].mxu0 %vm242_vm1, %v1547_v6  ;;  %1484 = vmatmul.mubr.msk.bf16.gmra.mrb[4].mxu1 %vm242_vm1, %v1556_v7 }
  0x17   :  { %1427 = vmatprep.mubr.msk.bf16.mxu0 %vm1576_vm0, %v1575_v0  ;;  %1487 = vmatprep.mubr.msk.bf16.mxu1 %vm1576_vm0, %v1575_v0 }
  0x1e   :  { %1428 = vmatmul.mubr.msk.bf16.gmra.mrb[8].mxu0 %vm242_vm1, %v1548_v8  ;;  %1488 = vmatmul.mubr.msk.bf16.gmra.mrb[8].mxu1 %vm242_vm1, %v1558_v9 }
  0x1f   :  { %1431 = vmatprep.mubr.msk.bf16.mxu0 %vm1576_vm0, %v1575_v0  ;;  %1491 = vmatprep.mubr.msk.bf16.mxu1 %vm1576_vm0, %v1575_v0 }
  0x26   :  { %1432 = vmatmul.mubr.msk.bf16.gmra.mrb[12].mxu0 %vm242_vm1, %v1549_v10  ;;  %1492 = vmatmul.mubr.msk.bf16.gmra.mrb[12].mxu1 %vm242_vm1, %v1560_v11 }
  0x27   :  { %1435 = vmatprep.mubr.msk.bf16.mxu0 %vm1576_vm0, %v1575_v0  ;;  %1495 = vmatprep.mubr.msk.bf16.mxu1 %vm1576_vm0, %v1575_v0 }
  0x2e   :  { %1436 = vmatmul.mubr.msk.bf16.gmra.mrb[16].mxu0 %vm242_vm1, %v1550_v12  ;;  %1496 = vmatmul.mubr.msk.bf16.gmra.mrb[16].mxu1 %vm242_vm1, %v1562_v13 }
  0x2f   :  { %1439 = vmatprep.mubr.msk.bf16.mxu0 %vm1576_vm0, %v1575_v0  ;;  %1499 = vmatprep.mubr.msk.bf16.mxu1 %vm1576_vm0, %v1575_v0 }
  0x36   :  { %1440 = vmatmul.mubr.msk.bf16.gmra.mrb[20].mxu0 %vm242_vm1, %v1551_v14  ;;  %1500 = vmatmul.mubr.msk.bf16.gmra.mrb[20].mxu1 %vm242_vm1, %v1564_v15 }
  0x37   :  { %1443 = vmatprep.mubr.msk.bf16.mxu0 %vm1576_vm0, %v1575_v0  ;;  %1503 = vmatprep.mubr.msk.bf16.mxu1 %vm1576_vm0, %v1575_v0 }
  0x3e   :  { %1444 = vmatmul.mubr.msk.bf16.gmra.mrb[24].mxu0 %vm242_vm1, %v1552_v16  ;;  %1504 = vmatmul.mubr.msk.bf16.gmra.mrb[24].mxu1 %vm242_vm1, %v1566_v17 }
  0x3f   :  { %1447 = vmatprep.mubr.msk.bf16.mxu0 %vm1576_vm0, %v1575_v0  ;;  %1507 = vmatprep.mubr.msk.bf16.mxu1 %vm1576_vm0, %v1575_v0 }
  0x46   :  { %1448 = vmatmul.mubr.msk.bf16.gmra.mrb[28].mxu0 %vm242_vm1, %v1553_v18  ;;  %1508 = vmatmul.mubr.msk.bf16.gmra.mrb[28].mxu1 %vm242_vm1, %v1568_v19 }
  0x47   :  { %1451 = vmatprep.mubr.msk.bf16.mxu0 %vm1576_vm0, %v1575_v0  ;;  %1511 = vmatprep.mubr.msk.bf16.mxu1 %vm1576_vm0, %v1575_v0 }
  0x4e   :  { %1452 = vmatmul.mubr.msk.bf16.gmra.mrb[32].mxu0 %vm242_vm1, %v1555_v20  ;;  %1512 = vmatmul.mubr.msk.bf16.gmra.mrb[32].mxu1 %vm242_vm1, %v1569_v21 }
  0x4f   :  { %1455 = vmatprep.mubr.msk.bf16.mxu0 %vm1576_vm0, %v1575_v0  ;;  %1515 = vmatprep.mubr.msk.bf16.mxu1 %vm1576_vm0, %v1575_v0 }
  0x56   :  { %1456 = vmatmul.mubr.msk.bf16.gmra.mrb[36].mxu0 %vm242_vm1, %v1557_v22  ;;  %1516 = vmatmul.mubr.msk.bf16.gmra.mrb[36].mxu1 %vm242_vm1, %v1570_v23 }
  0x57   :  { %1459 = vmatprep.mubr.msk.bf16.mxu0 %vm1576_vm0, %v1575_v0  ;;  %1519 = vmatprep.mubr.msk.bf16.mxu1 %vm1576_vm0, %v1575_v0 }
  0x5e   :  { %1460 = vmatmul.mubr.msk.bf16.gmra.mrb[40].mxu0 %vm242_vm1, %v1559_v24  ;;  %1520 = vmatmul.mubr.msk.bf16.gmra.mrb[40].mxu1 %vm242_vm1, %v1571_v25 }
  0x5f   :  { %1463 = vmatprep.mubr.msk.bf16.mxu0 %vm1576_vm0, %v1575_v0  ;;  %1523 = vmatprep.mubr.msk.bf16.mxu1 %vm1576_vm0, %v1575_v0 }
  0x66   :  { %1464 = vmatmul.mubr.msk.bf16.gmra.mrb[44].mxu0 %vm242_vm1, %v1561_v26  ;;  %1524 = vmatmul.mubr.msk.bf16.gmra.mrb[44].mxu1 %vm242_vm1, %v1572_v27 }
  0x67   :  { %1467 = vmatprep.mubr.msk.bf16.mxu0 %vm1576_vm0, %v1575_v0  ;;  %1527 = vmatprep.mubr.msk.bf16.mxu1 %vm1576_vm0, %v1575_v0 }
  0x6e   :  { %1468 = vmatmul.mubr.msk.bf16.gmra.mrb[48].mxu0 %vm242_vm1, %v1563_v28  ;;  %1528 = vmatmul.mubr.msk.bf16.gmra.mrb[48].mxu1 %vm242_vm1, %v1573_v29 }
  0x6f   :  { %1471 = vmatprep.mubr.msk.bf16.mxu0 %vm1576_vm0, %v1575_v0  ;;  %1531 = vmatprep.mubr.msk.bf16.mxu1 %vm1576_vm0, %v1575_v0 }
  0x76   :  { %1472 = vmatmul.mubr.msk.bf16.gmra.mrb[52].mxu0 %vm242_vm1, %v1565_v30  ;;  %1532 = vmatmul.mubr.msk.bf16.gmra.mrb[52].mxu1 %vm242_vm1, %v1574_v31 }
  0x77   :  { %1475 = vmatprep.mubr.msk.bf16.mxu0 %vm1576_vm0, %v1575_v0 }
  0x7e   :  { %1476 = vmatmul.mubr.msk.bf16.gmra.mrb[56].mxu0 %vm242_vm1, %v1567_v32 }
  0xe1   :  { %v364_v33 = vpop.f32.mrb[0].mxu0  ;;  %v1791_v34 = vpop.f32.mrb[0].mxu1 }
  0xe2   :  { %596 = vst.msk [vmem:[%s2305_s2] sm:$0xff] %vm595_vm2, %v364_v33  ;;  %v1128_v35 = vmul.f32 %v364_v33, %v364_v33  ;;  %v1421_v36 = vpop.f32.mrb[1].mxu0  ;;  %626 = vst.msk [vmem:[%s2305_s2 + $0xf0] sm:$0xff] %vm595_vm2, %v1791_v34  ;;  %v1481_v37 = vpop.f32.mrb[1].mxu1  ;;  %v1005_v40 = vsel %vm595_vm2, %v364_v33, 0.0 }
  0xe3   :  { %v367_v38 = vpop.f32.mrb[2].mxu0  ;;  %v1802_v39 = vpop.f32.mrb[2].mxu1 }
  0xe4   :  { %597 = vst.msk [vmem:[%s2305_s2 + $0x8] sm:$0xff] %vm595_vm2, %v367_v38  ;;  %v1006_v41 = vsel %vm595_vm2, %v367_v38, 0.0  ;;  %v1129_v42 = vmul.f32 %v367_v38, %v367_v38  ;;  %v1422_v43 = vpop.f32.mrb[3].mxu0  ;;  %627 = vst.msk [vmem:[%s2305_s2 + $0xf8] sm:$0xff] %vm595_vm2, %v1802_v39  ;;  %v1482_v44 = vpop.f32.mrb[3].mxu1  ;;  %v1186_v46 = vsel %vm595_vm2, %v1128_v35, 0.0 }
  0xe5   :  { %v1007_v45 = vadd.f32 %v1006_v41, %v1005_v40 }
  0xe6   :  { %v1187_v47 = vsel %vm595_vm2, %v1129_v42, 0.0 }
  0xe7   :  { %v1188_v48 = vadd.f32 %v1187_v47, %v1186_v46 }
  0xe9   :  { %v372_v49 = vpop.f32.mrb[4].mxu0  ;;  %v1817_v50 = vpop.f32.mrb[4].mxu1 }
  0xea   :  { %598 = vst.msk [vmem:[%s2305_s2 + $0x10] sm:$0xff] %vm595_vm2, %v372_v49  ;;  %v1008_v51 = vsel %vm595_vm2, %v372_v49, 0.0  ;;  %v1130_v52 = vmul.f32 %v372_v49, %v372_v49  ;;  %v1425_v53 = vpop.f32.mrb[5].mxu0  ;;  %628 = vst.msk [vmem:[%s2305_s2 + $0x100] sm:$0xff] %vm595_vm2, %v1817_v50  ;;  %v1485_v54 = vpop.f32.mrb[5].mxu1 }
  0xeb   :  { %v1009_v55 = vadd.f32 %v1008_v51, %v1007_v45  ;;  %v375_v56 = vpop.f32.mrb[6].mxu0  ;;  %v1829_v57 = vpop.f32.mrb[6].mxu1 }
  0xec   :  { %v1189_v58 = vsel %vm595_vm2, %v1130_v52, 0.0  ;;  %599 = vst.msk [vmem:[%s2305_s2 + $0x18] sm:$0xff] %vm595_vm2, %v375_v56  ;;  %v1010_v59 = vsel %vm595_vm2, %v375_v56, 0.0  ;;  %v1131_v60 = vmul.f32 %v375_v56, %v375_v56  ;;  %v1426_v61 = vpop.f32.mrb[7].mxu0  ;;  %629 = vst.msk [vmem:[%s2305_s2 + $0x108] sm:$0xff] %vm595_vm2, %v1829_v57  ;;  %v1486_v62 = vpop.f32.mrb[7].mxu1 }
  0xed   :  { %v1190_v63 = vadd.f32 %v1189_v58, %v1188_v48  ;;  %v1011_v0 = vadd.f32 %v1010_v59, %v1009_v55 }
  0xee   :  { %v1191_v1 = vsel %vm595_vm2, %v1131_v60, 0.0 }
  0xef   :  { %v1192_v2 = vadd.f32 %v1191_v1, %v1190_v63 }
  0xf1   :  { %v380_v3 = vpop.f32.mrb[8].mxu0  ;;  %v1843_v4 = vpop.f32.mrb[8].mxu1 }
  0xf2   :  { %600 = vst.msk [vmem:[%s2305_s2 + $0x20] sm:$0xff] %vm595_vm2, %v380_v3  ;;  %v1012_v5 = vsel %vm595_vm2, %v380_v3, 0.0  ;;  %v1132_v6 = vmul.f32 %v380_v3, %v380_v3  ;;  %v1429_v7 = vpop.f32.mrb[9].mxu0  ;;  %630 = vst.msk [vmem:[%s2305_s2 + $0x110] sm:$0xff] %vm595_vm2, %v1843_v4  ;;  %v1489_v8 = vpop.f32.mrb[9].mxu1 }
  0xf3   :  { %v1013_v9 = vadd.f32 %v1012_v5, %v1011_v0  ;;  %v383_v10 = vpop.f32.mrb[10].mxu0  ;;  %v1855_v11 = vpop.f32.mrb[10].mxu1 }
  0xf4   :  { %v1193_v12 = vsel %vm595_vm2, %v1132_v6, 0.0  ;;  %601 = vst.msk [vmem:[%s2305_s2 + $0x28] sm:$0xff] %vm595_vm2, %v383_v10  ;;  %v1014_v13 = vsel %vm595_vm2, %v383_v10, 0.0  ;;  %v1133_v14 = vmul.f32 %v383_v10, %v383_v10  ;;  %v1430_v15 = vpop.f32.mrb[11].mxu0  ;;  %631 = vst.msk [vmem:[%s2305_s2 + $0x118] sm:$0xff] %vm595_vm2, %v1855_v11  ;;  %v1490_v16 = vpop.f32.mrb[11].mxu1 }
  0xf5   :  { %v1194_v17 = vadd.f32 %v1193_v12, %v1192_v2  ;;  %v1015_v18 = vadd.f32 %v1014_v13, %v1013_v9 }
  0xf6   :  { %v1195_v19 = vsel %vm595_vm2, %v1133_v14, 0.0 }
  0xf7   :  { %v1196_v20 = vadd.f32 %v1195_v19, %v1194_v17 }
  0xf9   :  { %v388_v21 = vpop.f32.mrb[12].mxu0  ;;  %v1869_v22 = vpop.f32.mrb[12].mxu1 }
  0xfa   :  { %602 = vst.msk [vmem:[%s2305_s2 + $0x30] sm:$0xff] %vm595_vm2, %v388_v21  ;;  %v1016_v23 = vsel %vm595_vm2, %v388_v21, 0.0  ;;  %v1134_v24 = vmul.f32 %v388_v21, %v388_v21  ;;  %v1433_v25 = vpop.f32.mrb[13].mxu0  ;;  %632 = vst.msk [vmem:[%s2305_s2 + $0x120] sm:$0xff] %vm595_vm2, %v1869_v22  ;;  %v1493_v26 = vpop.f32.mrb[13].mxu1 }
  0xfb   :  { %v1017_v27 = vadd.f32 %v1016_v23, %v1015_v18  ;;  %v391_v28 = vpop.f32.mrb[14].mxu0  ;;  %v1881_v29 = vpop.f32.mrb[14].mxu1 }
  0xfc   :  { %v1197_v30 = vsel %vm595_vm2, %v1134_v24, 0.0  ;;  %603 = vst.msk [vmem:[%s2305_s2 + $0x38] sm:$0xff] %vm595_vm2, %v391_v28  ;;  %v1018_v31 = vsel %vm595_vm2, %v391_v28, 0.0  ;;  %v1135_v32 = vmul.f32 %v391_v28, %v391_v28  ;;  %v1434_v33 = vpop.f32.mrb[15].mxu0  ;;  %633 = vst.msk [vmem:[%s2305_s2 + $0x128] sm:$0xff] %vm595_vm2, %v1881_v29  ;;  %v1494_v35 = vpop.f32.mrb[15].mxu1 }
  0xfd   :  { %v1198_v36 = vadd.f32 %v1197_v30, %v1196_v20  ;;  %v1019_v37 = vadd.f32 %v1018_v31, %v1017_v27 }
  0xfe   :  { %v1199_v38 = vsel %vm595_vm2, %v1135_v32, 0.0 }
  0xff   :  { %v1200_v40 = vadd.f32 %v1199_v38, %v1198_v36 }
 0x101   :  { %v396_v41 = vpop.f32.mrb[16].mxu0  ;;  %v1895_v42 = vpop.f32.mrb[16].mxu1 }
 0x102   :  { %604 = vst.msk [vmem:[%s2305_s2 + $0x40] sm:$0xff] %vm595_vm2, %v396_v41  ;;  %v1020_v43 = vsel %vm595_vm2, %v396_v41, 0.0  ;;  %v1136_v44 = vmul.f32 %v396_v41, %v396_v41  ;;  %v1437_v45 = vpop.f32.mrb[17].mxu0  ;;  %634 = vst.msk [vmem:[%s2305_s2 + $0x130] sm:$0xff] %vm595_vm2, %v1895_v42  ;;  %v1497_v46 = vpop.f32.mrb[17].mxu1 }
 0x103   :  { %v1021_v47 = vadd.f32 %v1020_v43, %v1019_v37  ;;  %v399_v48 = vpop.f32.mrb[18].mxu0  ;;  %v1907_v49 = vpop.f32.mrb[18].mxu1 }
 0x104   :  { %v1201_v51 = vsel %vm595_vm2, %v1136_v44, 0.0  ;;  %605 = vst.msk [vmem:[%s2305_s2 + $0x48] sm:$0xff] %vm595_vm2, %v399_v48  ;;  %v1022_v52 = vsel %vm595_vm2, %v399_v48, 0.0  ;;  %v1137_v53 = vmul.f32 %v399_v48, %v399_v48  ;;  %v1438_v54 = vpop.f32.mrb[19].mxu0  ;;  %635 = vst.msk [vmem:[%s2305_s2 + $0x138] sm:$0xff] %vm595_vm2, %v1907_v49  ;;  %v1498_v55 = vpop.f32.mrb[19].mxu1 }
 0x105   :  { %v1202_v56 = vadd.f32 %v1201_v51, %v1200_v40  ;;  %v1023_v58 = vadd.f32 %v1022_v52, %v1021_v47 }
 0x106   :  { %v1203_v59 = vsel %vm595_vm2, %v1137_v53, 0.0 }
 0x107   :  { %v1204_v60 = vadd.f32 %v1203_v59, %v1202_v56 }
 0x109   :  { %v404_v61 = vpop.f32.mrb[20].mxu0  ;;  %v1921_v62 = vpop.f32.mrb[20].mxu1 }
 0x10a   :  { %606 = vst.msk [vmem:[%s2305_s2 + $0x50] sm:$0xff] %vm595_vm2, %v404_v61  ;;  %v1024_v63 = vsel %vm595_vm2, %v404_v61, 0.0  ;;  %v1138_v0 = vmul.f32 %v404_v61, %v404_v61  ;;  %v1441_v1 = vpop.f32.mrb[21].mxu0  ;;  %636 = vst.msk [vmem:[%s2305_s2 + $0x140] sm:$0xff] %vm595_vm2, %v1921_v62  ;;  %v1501_v2 = vpop.f32.mrb[21].mxu1 }
 0x10b   :  { %v1025_v3 = vadd.f32 %v1024_v63, %v1023_v58  ;;  %v407_v5 = vpop.f32.mrb[22].mxu0  ;;  %v1933_v6 = vpop.f32.mrb[22].mxu1 }
 0x10c   :  { %v1205_v7 = vsel %vm595_vm2, %v1138_v0, 0.0  ;;  %607 = vst.msk [vmem:[%s2305_s2 + $0x58] sm:$0xff] %vm595_vm2, %v407_v5  ;;  %v1026_v8 = vsel %vm595_vm2, %v407_v5, 0.0  ;;  %v1139_v9 = vmul.f32 %v407_v5, %v407_v5  ;;  %v1442_v10 = vpop.f32.mrb[23].mxu0  ;;  %637 = vst.msk [vmem:[%s2305_s2 + $0x148] sm:$0xff] %vm595_vm2, %v1933_v6  ;;  %v1502_v12 = vpop.f32.mrb[23].mxu1 }
 0x10d   :  { %v1206_v13 = vadd.f32 %v1205_v7, %v1204_v60  ;;  %v1027_v14 = vadd.f32 %v1026_v8, %v1025_v3 }
 0x10e   :  { %v1207_v15 = vsel %vm595_vm2, %v1139_v9, 0.0 }
 0x10f   :  { %v1208_v16 = vadd.f32 %v1207_v15, %v1206_v13 }
 0x111   :  { %v412_v17 = vpop.f32.mrb[24].mxu0  ;;  %v1947_v18 = vpop.f32.mrb[24].mxu1 }
 0x112   :  { %608 = vst.msk [vmem:[%s2305_s2 + $0x60] sm:$0xff] %vm595_vm2, %v412_v17  ;;  %v1028_v19 = vsel %vm595_vm2, %v412_v17, 0.0  ;;  %v1140_v20 = vmul.f32 %v412_v17, %v412_v17  ;;  %v1445_v21 = vpop.f32.mrb[25].mxu0  ;;  %638 = vst.msk [vmem:[%s2305_s2 + $0x150] sm:$0xff] %vm595_vm2, %v1947_v18  ;;  %v1505_v23 = vpop.f32.mrb[25].mxu1 }
 0x113   :  { %v1029_v24 = vadd.f32 %v1028_v19, %v1027_v14  ;;  %v415_v25 = vpop.f32.mrb[26].mxu0  ;;  %v1959_v26 = vpop.f32.mrb[26].mxu1 }
 0x114   :  { %v1209_v27 = vsel %vm595_vm2, %v1140_v20, 0.0  ;;  %609 = vst.msk [vmem:[%s2305_s2 + $0x68] sm:$0xff] %vm595_vm2, %v415_v25  ;;  %v1030_v28 = vsel %vm595_vm2, %v415_v25, 0.0  ;;  %v1141_v30 = vmul.f32 %v415_v25, %v415_v25  ;;  %v1446_v31 = vpop.f32.mrb[27].mxu0  ;;  %639 = vst.msk [vmem:[%s2305_s2 + $0x158] sm:$0xff] %vm595_vm2, %v1959_v26  ;;  %v1506_v32 = vpop.f32.mrb[27].mxu1 }
 0x115   :  { %v1210_v33 = vadd.f32 %v1209_v27, %v1208_v16  ;;  %v1031_v35 = vadd.f32 %v1030_v28, %v1029_v24 }
 0x116   :  { %v1211_v36 = vsel %vm595_vm2, %v1141_v30, 0.0 }
 0x117   :  { %v1212_v37 = vadd.f32 %v1211_v36, %v1210_v33 }
 0x119   :  { %v420_v38 = vpop.f32.mrb[28].mxu0  ;;  %v1973_v40 = vpop.f32.mrb[28].mxu1 }
 0x11a   :  { %610 = vst.msk [vmem:[%s2305_s2 + $0x70] sm:$0xff] %vm595_vm2, %v420_v38  ;;  %v1032_v41 = vsel %vm595_vm2, %v420_v38, 0.0  ;;  %v1142_v43 = vmul.f32 %v420_v38, %v420_v38  ;;  %v1449_v44 = vpop.f32.mrb[29].mxu0  ;;  %640 = vst.msk [vmem:[%s2305_s2 + $0x160] sm:$0xff] %vm595_vm2, %v1973_v40  ;;  %v1509_v45 = vpop.f32.mrb[29].mxu1 }
 0x11b   :  { %v1033_v46 = vadd.f32 %v1032_v41, %v1031_v35  ;;  %v423_v47 = vpop.f32.mrb[30].mxu0  ;;  %v1985_v48 = vpop.f32.mrb[30].mxu1 }
 0x11c   :  { %v1213_v51 = vsel %vm595_vm2, %v1142_v43, 0.0  ;;  %611 = vst.msk [vmem:[%s2305_s2 + $0x78] sm:$0xff] %vm595_vm2, %v423_v47  ;;  %v1034_v52 = vsel %vm595_vm2, %v423_v47, 0.0  ;;  %v1143_v53 = vmul.f32 %v423_v47, %v423_v47  ;;  %v1450_v54 = vpop.f32.mrb[31].mxu0  ;;  %641 = vst.msk [vmem:[%s2305_s2 + $0x168] sm:$0xff] %vm595_vm2, %v1985_v48  ;;  %v1510_v55 = vpop.f32.mrb[31].mxu1 }
 0x11d   :  { %v1214_v56 = vadd.f32 %v1213_v51, %v1212_v37  ;;  %v1035_v58 = vadd.f32 %v1034_v52, %v1033_v46 }
 0x11e   :  { %v1215_v59 = vsel %vm595_vm2, %v1143_v53, 0.0 }
 0x11f   :  { %v1216_v60 = vadd.f32 %v1215_v59, %v1214_v56 }
 0x121   :  { %v428_v61 = vpop.f32.mrb[32].mxu0  ;;  %v1999_v63 = vpop.f32.mrb[32].mxu1 }
 0x122   :  { %612 = vst.msk [vmem:[%s2305_s2 + $0x80] sm:$0xff] %vm595_vm2, %v428_v61  ;;  %v1036_v0 = vsel %vm595_vm2, %v428_v61, 0.0  ;;  %v1144_v1 = vmul.f32 %v428_v61, %v428_v61  ;;  %v1453_v2 = vpop.f32.mrb[33].mxu0  ;;  %642 = vst.msk [vmem:[%s2305_s2 + $0x170] sm:$0xff] %vm595_vm2, %v1999_v63  ;;  %v1513_v3 = vpop.f32.mrb[33].mxu1 }
 0x123   :  { %v1037_v5 = vadd.f32 %v1036_v0, %v1035_v58  ;;  %v431_v7 = vpop.f32.mrb[34].mxu0  ;;  %v2011_v8 = vpop.f32.mrb[34].mxu1 }
 0x124   :  { %v1217_v9 = vsel %vm595_vm2, %v1144_v1, 0.0  ;;  %613 = vst.msk [vmem:[%s2305_s2 + $0x88] sm:$0xff] %vm595_vm2, %v431_v7  ;;  %v1038_v10 = vsel %vm595_vm2, %v431_v7, 0.0  ;;  %v1145_v12 = vmul.f32 %v431_v7, %v431_v7  ;;  %v1454_v13 = vpop.f32.mrb[35].mxu0  ;;  %643 = vst.msk [vmem:[%s2305_s2 + $0x178] sm:$0xff] %vm595_vm2, %v2011_v8  ;;  %v1514_v14 = vpop.f32.mrb[35].mxu1 }
 0x125   :  { %v1218_v15 = vadd.f32 %v1217_v9, %v1216_v60  ;;  %v1039_v16 = vadd.f32 %v1038_v10, %v1037_v5 }
 0x126   :  { %v1219_v17 = vsel %vm595_vm2, %v1145_v12, 0.0 }
 0x127   :  { %v1220_v19 = vadd.f32 %v1219_v17, %v1218_v15 }
 0x129   :  { %v436_v20 = vpop.f32.mrb[36].mxu0  ;;  %v2025_v21 = vpop.f32.mrb[36].mxu1 }
 0x12a   :  { %614 = vst.msk [vmem:[%s2305_s2 + $0x90] sm:$0xff] %vm595_vm2, %v436_v20  ;;  %v1040_v23 = vsel %vm595_vm2, %v436_v20, 0.0  ;;  %v1146_v24 = vmul.f32 %v436_v20, %v436_v20  ;;  %v1457_v25 = vpop.f32.mrb[37].mxu0  ;;  %644 = vst.msk [vmem:[%s2305_s2 + $0x180] sm:$0xff] %vm595_vm2, %v2025_v21  ;;  %v1517_v27 = vpop.f32.mrb[37].mxu1 }
 0x12b   :  { %v1041_v28 = vadd.f32 %v1040_v23, %v1039_v16  ;;  %v439_v30 = vpop.f32.mrb[38].mxu0  ;;  %v2037_v31 = vpop.f32.mrb[38].mxu1 }
 0x12c   :  { %v1221_v32 = vsel %vm595_vm2, %v1146_v24, 0.0  ;;  %615 = vst.msk [vmem:[%s2305_s2 + $0x98] sm:$0xff] %vm595_vm2, %v439_v30  ;;  %v1042_v33 = vsel %vm595_vm2, %v439_v30, 0.0  ;;  %v1147_v35 = vmul.f32 %v439_v30, %v439_v30  ;;  %v1458_v36 = vpop.f32.mrb[39].mxu0  ;;  %645 = vst.msk [vmem:[%s2305_s2 + $0x188] sm:$0xff] %vm595_vm2, %v2037_v31  ;;  %v1518_v37 = vpop.f32.mrb[39].mxu1 }
 0x12d   :  { %v1222_v38 = vadd.f32 %v1221_v32, %v1220_v19  ;;  %v1043_v41 = vadd.f32 %v1042_v33, %v1041_v28 }
 0x12e   :  { %v1223_v43 = vsel %vm595_vm2, %v1147_v35, 0.0 }
 0x12f   :  { %v1224_v44 = vadd.f32 %v1223_v43, %v1222_v38 }
 0x131   :  { %v444_v45 = vpop.f32.mrb[40].mxu0  ;;  %v2051_v46 = vpop.f32.mrb[40].mxu1 }
 0x132   :  { %616 = vst.msk [vmem:[%s2305_s2 + $0xa0] sm:$0xff] %vm595_vm2, %v444_v45  ;;  %v1044_v47 = vsel %vm595_vm2, %v444_v45, 0.0  ;;  %v1148_v51 = vmul.f32 %v444_v45, %v444_v45  ;;  %v1461_v52 = vpop.f32.mrb[41].mxu0  ;;  %646 = vst.msk [vmem:[%s2305_s2 + $0x190] sm:$0xff] %vm595_vm2, %v2051_v46  ;;  %v1521_v53 = vpop.f32.mrb[41].mxu1 }
 0x133   :  { %v1045_v54 = vadd.f32 %v1044_v47, %v1043_v41  ;;  %v447_v55 = vpop.f32.mrb[42].mxu0  ;;  %v2063_v56 = vpop.f32.mrb[42].mxu1 }
 0x134   :  { %v1225_v58 = vsel %vm595_vm2, %v1148_v51, 0.0  ;;  %617 = vst.msk [vmem:[%s2305_s2 + $0xa8] sm:$0xff] %vm595_vm2, %v447_v55  ;;  %v1046_v59 = vsel %vm595_vm2, %v447_v55, 0.0  ;;  %v1149_v60 = vmul.f32 %v447_v55, %v447_v55  ;;  %v1462_v61 = vpop.f32.mrb[43].mxu0  ;;  %647 = vst.msk [vmem:[%s2305_s2 + $0x198] sm:$0xff] %vm595_vm2, %v2063_v56  ;;  %v1522_v0 = vpop.f32.mrb[43].mxu1 }
 0x135   :  { %v1226_v1 = vadd.f32 %v1225_v58, %v1224_v44  ;;  %v1047_v2 = vadd.f32 %v1046_v59, %v1045_v54 }
 0x136   :  { %v1227_v3 = vsel %vm595_vm2, %v1149_v60, 0.0 }
 0x137   :  { %v1228_v5 = vadd.f32 %v1227_v3, %v1226_v1 }
 0x139   :  { %v452_v7 = vpop.f32.mrb[44].mxu0  ;;  %v2077_v9 = vpop.f32.mrb[44].mxu1 }
 0x13a   :  { %618 = vst.msk [vmem:[%s2305_s2 + $0xb0] sm:$0xff] %vm595_vm2, %v452_v7  ;;  %v1048_v10 = vsel %vm595_vm2, %v452_v7, 0.0  ;;  %v1150_v12 = vmul.f32 %v452_v7, %v452_v7  ;;  %v1465_v13 = vpop.f32.mrb[45].mxu0  ;;  %648 = vst.msk [vmem:[%s2305_s2 + $0x1a0] sm:$0xff] %vm595_vm2, %v2077_v9  ;;  %v1525_v14 = vpop.f32.mrb[45].mxu1 }
 0x13b   :  { %v1049_v15 = vadd.f32 %v1048_v10, %v1047_v2  ;;  %v455_v16 = vpop.f32.mrb[46].mxu0  ;;  %v2089_v17 = vpop.f32.mrb[46].mxu1 }
 0x13c   :  { %v1229_v19 = vsel %vm595_vm2, %v1150_v12, 0.0  ;;  %619 = vst.msk [vmem:[%s2305_s2 + $0xb8] sm:$0xff] %vm595_vm2, %v455_v16  ;;  %v1050_v20 = vsel %vm595_vm2, %v455_v16, 0.0  ;;  %v1151_v23 = vmul.f32 %v455_v16, %v455_v16  ;;  %v1466_v24 = vpop.f32.mrb[47].mxu0  ;;  %649 = vst.msk [vmem:[%s2305_s2 + $0x1a8] sm:$0xff] %vm595_vm2, %v2089_v17  ;;  %v1526_v25 = vpop.f32.mrb[47].mxu1 }
 0x13d   :  { %v1230_v27 = vadd.f32 %v1229_v19, %v1228_v5  ;;  %v1051_v28 = vadd.f32 %v1050_v20, %v1049_v15 }
 0x13e   :  { %v1231_v30 = vsel %vm595_vm2, %v1151_v23, 0.0 }
 0x13f   :  { %v1232_v32 = vadd.f32 %v1231_v30, %v1230_v27 }
 0x141   :  { %v460_v33 = vpop.f32.mrb[48].mxu0  ;;  %v2103_v35 = vpop.f32.mrb[48].mxu1 }
 0x142   :  { %620 = vst.msk [vmem:[%s2305_s2 + $0xc0] sm:$0xff] %vm595_vm2, %v460_v33  ;;  %v1052_v36 = vsel %vm595_vm2, %v460_v33, 0.0  ;;  %v1152_v37 = vmul.f32 %v460_v33, %v460_v33  ;;  %v1469_v38 = vpop.f32.mrb[49].mxu0  ;;  %650 = vst.msk [vmem:[%s2305_s2 + $0x1b0] sm:$0xff] %vm595_vm2, %v2103_v35  ;;  %v1529_v41 = vpop.f32.mrb[49].mxu1 }
 0x143   :  { %v1053_v43 = vadd.f32 %v1052_v36, %v1051_v28  ;;  %v463_v44 = vpop.f32.mrb[50].mxu0  ;;  %v2115_v45 = vpop.f32.mrb[50].mxu1 }
 0x144   :  { %v1233_v47 = vsel %vm595_vm2, %v1152_v37, 0.0  ;;  %621 = vst.msk [vmem:[%s2305_s2 + $0xc8] sm:$0xff] %vm595_vm2, %v463_v44  ;;  %v1054_v51 = vsel %vm595_vm2, %v463_v44, 0.0  ;;  %v1153_v52 = vmul.f32 %v463_v44, %v463_v44  ;;  %v1470_v53 = vpop.f32.mrb[51].mxu0  ;;  %651 = vst.msk [vmem:[%s2305_s2 + $0x1b8] sm:$0xff] %vm595_vm2, %v2115_v45  ;;  %v1530_v54 = vpop.f32.mrb[51].mxu1  ;;  %v1158_v37 = vmul.f32 %v1791_v34, %v1791_v34 }
 0x145   :  { %v1234_v55 = vadd.f32 %v1233_v47, %v1232_v32  ;;  %v1055_v58 = vadd.f32 %v1054_v51, %v1053_v43  ;;  %v1159_v53 = vmul.f32 %v1802_v39, %v1802_v39 }
 0x146   :  { %v1235_v59 = vsel %vm595_vm2, %v1153_v52, 0.0  ;;  %v1064_v52 = vsel %vm595_vm2, %v1791_v34, 0.0  ;;  %v1068_v34 = vsel %vm595_vm2, %v1817_v50, 0.0 }
 0x147   :  { %v1236_v60 = vadd.f32 %v1235_v59, %v1234_v55  ;;  %v1245_v59 = vsel %vm595_vm2, %v1158_v37, 0.0 }
 0x149   :  { %v468_v61 = vpop.f32.mrb[52].mxu0  ;;  %v2129_v0 = vpop.f32.mrb[52].mxu1 }
 0x14a   :  { %622 = vst.msk [vmem:[%s2305_s2 + $0xd0] sm:$0xff] %vm595_vm2, %v468_v61  ;;  %v1056_v1 = vsel %vm595_vm2, %v468_v61, 0.0  ;;  %v1154_v2 = vmul.f32 %v468_v61, %v468_v61  ;;  %v1473_v3 = vpop.f32.mrb[53].mxu0  ;;  %652 = vst.msk [vmem:[%s2305_s2 + $0x1c0] sm:$0xff] %vm595_vm2, %v2129_v0  ;;  %v1533_v5 = vpop.f32.mrb[53].mxu1  ;;  %v1160_v61 = vmul.f32 %v1817_v50, %v1817_v50  ;;  %v1072_v50 = vsel %vm595_vm2, %v1843_v4, 0.0 }
 0x14b   :  { %v1057_v7 = vadd.f32 %v1056_v1, %v1055_v58  ;;  %v471_v10 = vpop.f32.mrb[54].mxu0  ;;  %v591_v12 = vpop.f32.mrb[54].mxu1  ;;  %v1247_v3 = vsel %vm595_vm2, %v1159_v53, 0.0  ;;  %v1161_v5 = vmul.f32 %v1829_v57, %v1829_v57 }
 0x14c   :  { %v1237_v13 = vsel %vm595_vm2, %v1154_v2, 0.0  ;;  %623 = vst.msk [vmem:[%s2305_s2 + $0xd8] sm:$0xff] %vm595_vm2, %v471_v10  ;;  %v1058_v14 = vsel %vm595_vm2, %v471_v10, 0.0  ;;  %v1155_v15 = vmul.f32 %v471_v10, %v471_v10  ;;  %v1474_v16 = vpop.f32.mrb[55].mxu0  ;;  %653 = vst.msk [vmem:[%s2305_s2 + $0x1c8] sm:$0xff] %vm595_vm2, %v591_v12  ;;  %v1534_v19 = vpop.f32.mrb[55].mxu1 }
 0x14d   :  { %v1238_v20 = vadd.f32 %v1237_v13, %v1236_v60  ;;  %v1059_v23 = vadd.f32 %v1058_v14, %v1057_v7  ;;  %v1066_v60 = vsel %vm595_vm2, %v1802_v39, 0.0  ;;  %v1249_v12 = vsel %vm595_vm2, %v1160_v61, 0.0 }
 0x14e   :  { %v1239_v24 = vsel %vm595_vm2, %v1155_v15, 0.0  ;;  %v1070_v39 = vsel %vm595_vm2, %v1829_v57, 0.0  ;;  %v1162_v13 = vmul.f32 %v1843_v4, %v1843_v4  ;;  %v1251_v16 = vsel %vm595_vm2, %v1161_v5, 0.0 }
 0x14f   :  { %v1240_v25 = vadd.f32 %v1239_v24, %v1238_v20  ;;  %v1163_v19 = vmul.f32 %v1855_v11, %v1855_v11  ;;  %v1074_v57 = vsel %vm595_vm2, %v1855_v11, 0.0  ;;  %v1076_v4 = vsel %vm595_vm2, %v1869_v22, 0.0 }
 0x150   :  { %v1253_v24 = vsel %vm595_vm2, %v1162_v13, 0.0  ;;  %v1078_v11 = vsel %vm595_vm2, %v1881_v29, 0.0 }
 0x151   :  { %v476_v27 = vpop.f32.mrb[56].mxu0 }
 0x152   :  { %624 = vst.msk [vmem:[%s2305_s2 + $0xe0] sm:$0xff] %vm595_vm2, %v476_v27  ;;  %v1060_v28 = vsel %vm595_vm2, %v476_v27, 0.0  ;;  %v1156_v30 = vmul.f32 %v476_v27, %v476_v27  ;;  %v1477_v32 = vpop.f32.mrb[57].mxu0 }
 0x153   :  { %v1061_v33 = vadd.f32 %v1060_v28, %v1059_v23  ;;  %v479_v36 = vpop.f32.mrb[58].mxu0  ;;  %v1165_v32 = vmul.f32 %v1881_v29, %v1881_v29  ;;  %v1082_v29 = vsel %vm595_vm2, %v1907_v49, 0.0 }
 0x154   :  { %v1241_v38 = vsel %vm595_vm2, %v1156_v30, 0.0  ;;  %625 = vst.msk [vmem:[%s2305_s2 + $0xe8] sm:$0xff] %vm595_vm2, %v479_v36  ;;  %v1062_v41 = vsel %vm595_vm2, %v479_v36, 0.0  ;;  %v1157_v43 = vmul.f32 %v479_v36, %v479_v36  ;;  %v1478_v44 = vpop.f32.mrb[59].mxu0  ;;  %v1255_v30 = vsel %vm595_vm2, %v1163_v19, 0.0 }
 0x155   :  { %v1242_v47 = vadd.f32 %v1241_v38, %v1240_v25  ;;  %v1063_v51 = vadd.f32 %v1062_v41, %v1061_v33  ;;  %v1164_v25 = vmul.f32 %v1869_v22, %v1869_v22  ;;  %v1166_v38 = vmul.f32 %v1895_v42, %v1895_v42 }
 0x156   :  { %v1243_v54 = vsel %vm595_vm2, %v1157_v43, 0.0  ;;  %v1259_v44 = vsel %vm595_vm2, %v1165_v32, 0.0  ;;  %v1080_v22 = vsel %vm595_vm2, %v1895_v42, 0.0  ;;  %v1084_v42 = vsel %vm595_vm2, %v1921_v62, 0.0 }
 0x157   :  { %v1065_v55 = vadd.f32 %v1064_v52, %v1063_v51  ;;  %v1244_v58 = vadd.f32 %v1243_v54, %v1242_v47  ;;  %v1257_v37 = vsel %vm595_vm2, %v1164_v25, 0.0  ;;  %v1167_v47 = vmul.f32 %v1907_v49, %v1907_v49 }
 0x158   :  { %v1261_v53 = vsel %vm595_vm2, %v1166_v38, 0.0  ;;  %v1168_v54 = vmul.f32 %v1921_v62, %v1921_v62  ;;  %v1086_v49 = vsel %vm595_vm2, %v1933_v6, 0.0  ;;  %v1088_v62 = vsel %vm595_vm2, %v1947_v18, 0.0 }
 0x159   :  { %v1067_v1 = vadd.f32 %v1066_v60, %v1065_v55  ;;  %v1246_v2 = vadd.f32 %v1245_v59, %v1244_v58  ;;  %v1263_v59 = vsel %vm595_vm2, %v1167_v47, 0.0  ;;  %v1169_v60 = vmul.f32 %v1933_v6, %v1933_v6 }
 0x15a   :  { %v1090_v6 = vsel %vm595_vm2, %v1959_v26, 0.0  ;;  %v1173_v19 = vmul.f32 %v1985_v48, %v1985_v48  ;;  %v654_v25 = vlaneseq }
 0x15b   :  { %v1069_v7 = vadd.f32 %v1068_v34, %v1067_v1  ;;  %v1248_v10 = vadd.f32 %v1247_v3, %v1246_v2  ;;  %v1265_v2 = vsel %vm595_vm2, %v1168_v54, 0.0  ;;  %v1170_v3 = vmul.f32 %v1947_v18, %v1947_v18 }
 0x15c   :  { %v1092_v18 = vsel %vm595_vm2, %v1973_v40, 0.0 }
 0x15d   :  { %v1071_v14 = vadd.f32 %v1070_v39, %v1069_v7  ;;  %v1250_v15 = vadd.f32 %v1249_v12, %v1248_v10  ;;  %v1267_v7 = vsel %vm595_vm2, %v1169_v60, 0.0  ;;  %v1171_v10 = vmul.f32 %v1959_v26, %v1959_v26 }
 0x15e   :  { %v1269_v13 = vsel %vm595_vm2, %v1170_v3, 0.0  ;;  %v1094_v26 = vsel %vm595_vm2, %v1985_v48, 0.0  ;;  %v1098_v48 = vsel %vm595_vm2, %v2011_v8, 0.0  ;;  %v1181_v3 = vmul.f32 %v2089_v17, %v2089_v17 }
 0x15f   :  { %v1073_v20 = vadd.f32 %v1072_v50, %v1071_v14  ;;  %v1252_v23 = vadd.f32 %v1251_v16, %v1250_v15  ;;  %v1172_v14 = vmul.f32 %v1973_v40, %v1973_v40  ;;  %v1271_v50 = vsel %vm595_vm2, %v1171_v10, 0.0 }
 0x160   :  { %v1096_v40 = vsel %vm595_vm2, %v1999_v63, 0.0  ;;  %v1182_v10 = vmul.f32 %v2103_v35, %v2103_v35 }
 0x161   :  { %v1075_v27 = vadd.f32 %v1074_v57, %v1073_v20  ;;  %v1254_v28 = vadd.f32 %v1253_v24, %v1252_v23  ;;  %v1273_v24 = vsel %vm595_vm2, %v1172_v14, 0.0  ;;  %v1174_v57 = vmul.f32 %v1999_v63, %v1999_v63 }
 0x162   :  { %v1100_v63 = vsel %vm595_vm2, %v2025_v21, 0.0 }
 0x163   :  { %v1077_v33 = vadd.f32 %v1076_v4, %v1075_v27  ;;  %v1256_v36 = vadd.f32 %v1255_v30, %v1254_v28  ;;  %v1275_v30 = vsel %vm595_vm2, %v1173_v19, 0.0  ;;  %v1175_v4 = vmul.f32 %v2011_v8, %v2011_v8 }
 0x164   :  { %v1102_v8 = vsel %vm595_vm2, %v2037_v31, 0.0 }
 0x165   :  { %v1258_v41 = vadd.f32 %v1257_v37, %v1256_v36  ;;  %v1079_v43 = vadd.f32 %v1078_v11, %v1077_v33  ;;  %v1277_v36 = vsel %vm595_vm2, %v1174_v57, 0.0  ;;  %v1176_v37 = vmul.f32 %v2025_v21, %v2025_v21 }
 0x166   :  { %v655_v11 = vshrl.u32 %v654_v25, 7  ;;  %v1104_v21 = vsel %vm595_vm2, %v2051_v46, 0.0 }
 0x167   :  { %v1081_v51 = vadd.f32 %v1080_v22, %v1079_v43  ;;  %v1260_v52 = vadd.f32 %v1259_v44, %v1258_v41  ;;  %v1279_v43 = vsel %vm595_vm2, %v1175_v4, 0.0  ;;  %v1177_v44 = vmul.f32 %v2037_v31, %v2037_v31 }
 0x168   :  { %v1106_v31 = vsel %vm595_vm2, %v2063_v56, 0.0 }
 0x169   :  { %v1083_v55 = vadd.f32 %v1082_v29, %v1081_v51  ;;  %v1262_v58 = vadd.f32 %v1261_v53, %v1260_v52  ;;  %v1281_v51 = vsel %vm595_vm2, %v1176_v37, 0.0  ;;  %v1178_v52 = vmul.f32 %v2051_v46, %v2051_v46 }
 0x16a   :  { %v711_v53 = vadd.s32 448, %v655_v11  ;;  %v1108_v46 = vsel %vm595_vm2, %v2077_v9, 0.0 }
 0x16b   :  { %v1085_v61 = vadd.f32 %v1084_v42, %v1083_v55  ;;  %v1264_v1 = vadd.f32 %v1263_v59, %v1262_v58  ;;  %v1283_v55 = vsel %vm595_vm2, %v1177_v44, 0.0  ;;  %v1179_v58 = vmul.f32 %v2063_v56, %v2063_v56 }
 0x16c   :  { %v1285_v60 = vsel %vm595_vm2, %v1178_v52, 0.0  ;;  %vm829_vm3 = vcmp.lt.s32.totalorder %v711_v53, 450 }
 0x16d   :  { %v1087_v34 = vadd.f32 %v1086_v49, %v1085_v61  ;;  %v1266_v5 = vadd.f32 %v1265_v2, %v1264_v1  ;;  %v1180_v61 = vmul.f32 %v2077_v9, %v2077_v9  ;;  %v1287_v49 = vsel %vm595_vm2, %v1179_v58, 0.0 }
 0x16e   :  { %v1112_v9 = vsel %vm595_vm2, %v2103_v35, 0.0 }
 0x16f   :  { %v1089_v12 = vadd.f32 %v1088_v62, %v1087_v34  ;;  %v1268_v39 = vadd.f32 %v1267_v7, %v1266_v5  ;;  %v1003_v7 = vsel %vm829_vm3, %v2129_v0, 0.0  ;;  %v1289_v56 = vsel %vm595_vm2, %v1180_v61, 0.0 }
 0x170   :  { %v1110_v62 = vsel %vm595_vm2, %v2089_v17, 0.0  ;;  %v1184_v14 = vmul.f32 %v1003_v7, %v1003_v7  ;;  %v1114_v17 = vsel %vm595_vm2, %v2115_v45, 0.0 }
 0x171   :  { %v1091_v15 = vadd.f32 %v1090_v6, %v1089_v12  ;;  %v1270_v16 = vadd.f32 %v1269_v13, %v1268_v39  ;;  %v1291_v13 = vsel %vm595_vm2, %v1181_v3, 0.0  ;;  %v1183_v6 = vmul.f32 %v2115_v45, %v2115_v45 }
 0x173   :  { %v1093_v20 = vadd.f32 %v1092_v18, %v1091_v15  ;;  %v1272_v23 = vadd.f32 %v1271_v50, %v1270_v16  ;;  %v1293_v16 = vsel %vm595_vm2, %v1182_v10, 0.0  ;;  %v1116_v50 = vsel %vm595_vm2, %v1003_v7, 0.0 }
 0x175   :  { %v1274_v27 = vadd.f32 %v1273_v24, %v1272_v23  ;;  %v1095_v28 = vadd.f32 %v1094_v26, %v1093_v20  ;;  %v1295_v20 = vsel %vm595_vm2, %v1183_v6, 0.0  ;;  %v1297_v23 = vsel %vm595_vm2, %v1184_v14, 0.0 }
 0x177   :  { %v1276_v32 = vadd.f32 %v1275_v30, %v1274_v27  ;;  %v1097_v33 = vadd.f32 %v1096_v40, %v1095_v28 }
 0x179   :  { %v1278_v38 = vadd.f32 %v1277_v36, %v1276_v32  ;;  %v1099_v41 = vadd.f32 %v1098_v48, %v1097_v33 }
 0x17b   :  { %v1280_v22 = vadd.f32 %v1279_v43, %v1278_v38  ;;  %v1101_v47 = vadd.f32 %v1100_v63, %v1099_v41 }
 0x17d   :  { %v1282_v29 = vadd.f32 %v1281_v51, %v1280_v22  ;;  %v1103_v54 = vadd.f32 %v1102_v8, %v1101_v47 }
 0x17f   :  { %v1284_v59 = vadd.f32 %v1283_v55, %v1282_v29  ;;  %v1105_v42 = vadd.f32 %v1104_v21, %v1103_v54 }
 0x181   :  { %v1286_v1 = vadd.f32 %v1285_v60, %v1284_v59  ;;  %v1107_v2 = vadd.f32 %v1106_v31, %v1105_v42 }
 0x183   :  { %v1288_v34 = vadd.f32 %v1287_v49, %v1286_v1  ;;  %v1109_v5 = vadd.f32 %v1108_v46, %v1107_v2 }
 0x185   :  { %v1290_v12 = vadd.f32 %v1289_v56, %v1288_v34  ;;  %v1111_v39 = vadd.f32 %v1110_v62, %v1109_v5 }
 0x187   :  { %v1292_v0 = vadd.f32 %v1291_v13, %v1290_v12  ;;  %v1113_v15 = vadd.f32 %v1112_v9, %v1111_v39 }
 0x189   :  { %v1294_v18 = vadd.f32 %v1293_v16, %v1292_v0  ;;  %v1115_v19 = vadd.f32 %v1114_v17, %v1113_v15 }
 0x18b   :  { %v1296_v35 = vadd.f32 %v1295_v20, %v1294_v18  ;;  %v1117_v24 = vadd.f32 %v1116_v50, %v1115_v19 }
 0x18d   :  { %v1120_v26 = vrot.slane %v1117_v24, 4  ;;  %v1298_v57 = vadd.f32 %v1297_v23, %v1296_v35 }
 0x18f   :  { %v1121_v25 = vadd.f32 %v1120_v26, %v1117_v24  ;;  %v1301_v27 = vrot.slane %v1298_v57, 4 }
 0x191   :  { %v1122_v28 = vrot.slane %v1121_v25, 2  ;;  %v1302_v30 = vadd.f32 %v1301_v27, %v1298_v57 }
 0x193   :  { %v1123_v40 = vadd.f32 %v1122_v28, %v1121_v25  ;;  %v1303_v4 = vrot.slane %v1302_v30, 2 }
 0x195   :  { %v1124_v32 = vrot.slane %v1123_v40, 1  ;;  %v1304_v45 = vadd.f32 %v1303_v4, %v1302_v30 }
 0x197   :  { %v1125_v33 = vadd.f32 %v1124_v32, %v1123_v40  ;;  %v1305_v36 = vrot.slane %v1304_v45, 1 }
 0x199   :  { %1127 = vst.msk [vmem:[%s2306_s3] sm:$0x1] %vm1126_vm4, %v1125_v33  ;;  %v1306_v48 = vadd.f32 %v1305_v36, %v1304_v45 }
 0x19b   :  { %1307 = vst.msk [vmem:[%s2307_s4] sm:$0x1] %vm1126_vm4, %v1306_v48 }

</bundles_post_ra>
